<compile_context>
chip_gen: v7x
topology: tpu7x:2x2x1
jax: 0.10.0
libtpu: 0.0.40
codegen_flags: <defaults>
</compile_context>

<pallas_src>
import functools

import jax
import jax.numpy as jnp
from jax.experimental import pallas as pl
from jax.experimental.pallas import tpu as pltpu

IN_DIM = 128
H_DIM = 64
LAT_DIM = 32
LAT_PAD = 128  # latent padded to a full lane width for lane-dense stores


def _round_up(x, m):
    return ((x + m - 1) // m) * m


def autoencoder_kernel(x_ref,
                       w1_ref, b1_ref,
                       w2_ref, b2_ref,
                       w3_ref, b3_ref,
                       w4_ref, b4_ref,
                       recon_ref, latent_ref):
    x = x_ref[...]  # (tile_b, 128), compute dtype (bf16)

    # --- encoder -----------------------------------------------------------
    # Linear(128 -> 64) + ReLU
    h1 = jnp.dot(x, w1_ref[...], preferred_element_type=jnp.float32) + b1_ref[...]
    h1 = jnp.maximum(h1, 0.0).astype(x.dtype)
    # Linear(64 -> 32) + ReLU, zero-padded to 128 output lanes (pad cols are 0)
    z = jnp.dot(h1, w2_ref[...], preferred_element_type=jnp.float32) + b2_ref[...]
    z = jnp.maximum(z, 0.0)                      # (tile_b, 128) f32, lane-dense

    # --- decoder -----------------------------------------------------------
    zc = z.astype(x.dtype)
    # Linear(32 -> 64) + ReLU (w3 padded with zero rows for the 96 pad lanes)
    h3 = jnp.dot(zc, w3_ref[...], preferred_element_type=jnp.float32) + b3_ref[...]
    h3 = jnp.maximum(h3, 0.0).astype(x.dtype)
    # Linear(64 -> 128) + ReLU
    r = jnp.dot(h3, w4_ref[...], preferred_element_type=jnp.float32) + b4_ref[...]
    r = jnp.maximum(r, 0.0)

    latent_ref[...] = z.astype(latent_ref.dtype)   # full 128-lane unmasked store
    recon_ref[...] = r.astype(recon_ref.dtype)


def init_params(key):
    """nn.Linear-style uniform(-1/sqrt(fan_in), +bound) init, f32.

    Weights stored transposed: (in_features, out_features); biases (1, out).
    """
    dims = [(IN_DIM, H_DIM), (H_DIM, LAT_DIM), (LAT_DIM, H_DIM), (H_DIM, IN_DIM)]
    params = []
    for fan_in, fan_out in dims:
        key, kw, kb = jax.random.split(key, 3)
        bound = 1.0 / (fan_in ** 0.5)
        w = jax.random.uniform(kw, (fan_in, fan_out), jnp.float32, -bound, bound)
        b = jax.random.uniform(kb, (1, fan_out), jnp.float32, -bound, bound)
        params += [w, b]
    return tuple(params)


def prepare_params(params, compute_dtype=jnp.bfloat16):
    """Cast weights to the MXU compute dtype and zero-pad the latent path
    (32 -> 128) so the kernel's latent output is lane-dense. Biases stay f32
    (they add into the f32 accumulator)."""
    w1, b1, w2, b2, w3, b3, w4, b4 = params
    # pad encoder layer-2 output features 32 -> 128 with zeros
    w2p = jnp.pad(w2, ((0, 0), (0, LAT_PAD - LAT_DIM)))
    b2p = jnp.pad(b2, ((0, 0), (0, LAT_PAD - LAT_DIM)))
    # pad decoder layer-1 input features 32 -> 128 with zero rows (no-op math)
    w3p = jnp.pad(w3, ((0, LAT_PAD - LAT_DIM), (0, 0)))
    cd = compute_dtype
    return (w1.astype(cd), b1.astype(jnp.float32),
            w2p.astype(cd), b2p.astype(jnp.float32),
            w3p.astype(cd), b3.astype(jnp.float32),
            w4.astype(cd), b4.astype(jnpp := jnp.float32) if False else w4.astype(cd),
            b4.astype(jnp.float32)) if False else (
        w1.astype(cd), b1.astype(jnp.float32),
        w2p.astype(cd), b2p.astype(jnp.float32),
        w3p.astype(cd), b3.astype(jnp.float32),
        w4.astype(cd), b4.astype(jnp.float32),
    )


@functools.partial(jax.jit, static_argnames=("tile_b", "compute_dtype"))
def base_autoencoder_forward(x, prepared_params, *, tile_b=512,
                             compute_dtype=jnp.bfloat16):
    """x: (B, 128). Returns (reconstructed (B, 128), latent (B, 32)) in x.dtype."""
    B, in_dim = x.shape
    assert in_dim == IN_DIM
    out_dtype = x.dtype

    w1, b1, w2, b2, w3, b3, w4, b4 = prepared_params

    # Effective tile: don't exceed the (sublane-rounded) batch, keep multiple of 8.
    eff_tile = min(tile_b, _round_up(B, 8))
    eff_tile = _round_up(eff_tile, 8)
    Bp = _round_up(B, eff_tile)
    if Bp != B:
        x = jnp.pad(x, ((0, Bp - B), (0, 0)))
    xc = x.astype(compute_dtype)

    grid = (Bp // eff_tile,)

    def x_map(i):
        return (i, 0)

    def full_map(i):
        return (0, 0)

    weight_specs = []
    for arr in (w1, b1, w2, b2, w3, b3, w4, b4):
        weight_specs.append(pl.BlockSpec(arr.shape, full_map))

    out_shapes = (
        jax.ShapeDtypeStruct((Bp, IN_DIM), out_dtype),    # reconstructed
        jax.ShapeDtypeStruct((Bp, LAT_PAD), out_dtype),   # lane-dense latent (padded)
    )

    recon, latent_pad = pl.pallas_call(
        autoencoder_kernel,
        out_shape=out_shapes,
        grid_spec=pltpu.PrefetchScalarGridSpec(
            num_scalar_prefetch=0,
            grid=grid,
            in_specs=[pl.BlockSpec((eff_tile, IN_DIM), x_map)] + weight_specs,
            out_specs=[
                pl.BlockSpec((eff_tile, IN_DIM), x_map),
                pl.BlockSpec((eff_tile, LAT_PAD), x_map),
            ],
        ),
        compiler_params=pltpu.CompilerParams(
            dimension_semantics=("parallel",),
        ),
    )(xc, w1, b1, w2, b2, w3, b3, w4, b4)

    return recon[:B], latent_pad[:B, :LAT_DIM]


def reference_forward(x, params):
    w1, b1, w2, b2, w3, b3, w4, b4 = params
    h1 = jnp.maximum(x @ w1 + b1, 0.0)
    z = jnp.maximum(h1 @ w2 + b2, 0.0)
    h3 = jnp.maximum(z @ w3 + b3, 0.0)
    r = jnp.maximum(h3 @ w4 + b4, 0.0)
    return r, z


if __name__ == "__main__":
    key = jax.random.PRNGKey(0)
    key, kx = jax.random.split(key)

    # 1024 rows -> grid of 2 at tile_b=512 (keeps both v7x TensorCores busy),
    # still a tiny problem (x is 512 KiB f32).
    B = 1024
    x = jax.random.normal(kx, (B, IN_DIM), jnp.float32)
    params = init_params(key)
    prepared = prepare_params(params, compute_dtype=jnp.bfloat16)

    recon, latent = base_autoencoder_forward(x, prepared, tile_b=512)
    recon = jax.block_until_ready(recon)
    latent = jax.block_until_ready(latent)

    recon_ref, latent_ref = reference_forward(x, params)
    assert recon.shape == (B, IN_DIM) and latent.shape == (B, LAT_DIM)
    # bf16 matmul operands with f32 accumulation -> loosened tolerance.
    assert jnp.allclose(recon, recon_ref, atol=5e-2, rtol=5e-2), (
        float(jnp.max(jnp.abs(recon - recon_ref))))
    assert jnp.allclose(latent, latent_ref, atol=5e-2, rtol=5e-2), (
        float(jnp.max(jnp.abs(latent - latent_ref))))

    print("KERNEL_OK")
</pallas_src>

<mosaic_0001>
module attributes {stable_mosaic.version = 11 : i64} {
  func.func @autoencoder_kernel(%arg0: i32, %arg1: memref<512x128xbf16, #tpu.memory_space<vmem>>, %arg2: memref<128x64xbf16, #tpu.memory_space<vmem>>, %arg3: memref<1x64xf32, #tpu.memory_space<vmem>>, %arg4: memref<64x128xbf16, #tpu.memory_space<vmem>>, %arg5: memref<1x128xf32, #tpu.memory_space<vmem>>, %arg6: memref<128x64xbf16, #tpu.memory_space<vmem>>, %arg7: memref<1x64xf32, #tpu.memory_space<vmem>>, %arg8: memref<64x128xbf16, #tpu.memory_space<vmem>>, %arg9: memref<1x128xf32, #tpu.memory_space<vmem>>, %arg10: memref<512x128xf32, #tpu.memory_space<vmem>>, %arg11: memref<512x128xf32, #tpu.memory_space<vmem>>) attributes {dimension_semantics = [#tpu.dimension_semantics<parallel>], iteration_bounds = array<i64: 2>, scalar_prefetch = 0 : i64, scratch_operands = 0 : i64, tpu.core_type = #tpu.core_type<tc>, window_params = [{transform_indices = @transform_0, window_bounds = array<i64: 512, 128>}, {pipeline_mode = #tpu.pipeline_mode<synchronous>, transform_indices = @transform_1, window_bounds = array<i64: 128, 64>}, {pipeline_mode = #tpu.pipeline_mode<synchronous>, transform_indices = @transform_2, window_bounds = array<i64: 1, 64>}, {pipeline_mode = #tpu.pipeline_mode<synchronous>, transform_indices = @transform_3, window_bounds = array<i64: 64, 128>}, {pipeline_mode = #tpu.pipeline_mode<synchronous>, transform_indices = @transform_4, window_bounds = array<i64: 1, 128>}, {pipeline_mode = #tpu.pipeline_mode<synchronous>, transform_indices = @transform_5, window_bounds = array<i64: 128, 64>}, {pipeline_mode = #tpu.pipeline_mode<synchronous>, transform_indices = @transform_6, window_bounds = array<i64: 1, 64>}, {pipeline_mode = #tpu.pipeline_mode<synchronous>, transform_indices = @transform_7, window_bounds = array<i64: 64, 128>}, {pipeline_mode = #tpu.pipeline_mode<synchronous>, transform_indices = @transform_8, window_bounds = array<i64: 1, 128>}, {transform_indices = @transform_9, window_bounds = array<i64: 512, 128>}, {transform_indices = @transform_10, window_bounds = array<i64: 512, 128>}]} {
    %c0 = arith.constant 0 : index
    %c0_0 = arith.constant 0 : index
    %0 = vector.load %arg1[%c0, %c0_0] : memref<512x128xbf16, #tpu.memory_space<vmem>>, vector<512x128xbf16>
    %c0_1 = arith.constant 0 : index
    %c0_2 = arith.constant 0 : index
    %1 = vector.load %arg2[%c0_1, %c0_2] : memref<128x64xbf16, #tpu.memory_space<vmem>>, vector<128x64xbf16>
    %cst = arith.constant dense<0.000000e+00> : vector<512x64xf32>
    %2 = tpu.matmul %0, %1, %cst {dimension_numbers = #tpu.dot_dimension_numbers<[1], [0], [0], [1], [0, 0, 1, 1], [], []>} : vector<512x128xbf16>, vector<128x64xbf16>, vector<512x64xf32> -> vector<512x64xf32>
    %c0_3 = arith.constant 0 : index
    %c0_4 = arith.constant 0 : index
    %3 = vector.load %arg3[%c0_3, %c0_4] : memref<1x64xf32, #tpu.memory_space<vmem>>, vector<1x64xf32>
    %4 = vector.broadcast %3 : vector<1x64xf32> to vector<512x64xf32>
    %5 = arith.addf %2, %4 : vector<512x64xf32>
    %cst_5 = arith.constant 0.000000e+00 : f32
    %6 = vector.broadcast %cst_5 : f32 to vector<512x64xf32>
    %7 = arith.maximumf %5, %6 : vector<512x64xf32>
    %8 = arith.truncf %7 : vector<512x64xf32> to vector<512x64xbf16>
    %c0_6 = arith.constant 0 : index
    %c0_7 = arith.constant 0 : index
    %9 = vector.load %arg4[%c0_6, %c0_7] : memref<64x128xbf16, #tpu.memory_space<vmem>>, vector<64x128xbf16>
    %cst_8 = arith.constant dense<0.000000e+00> : vector<512x128xf32>
    %10 = tpu.matmul %8, %9, %cst_8 {dimension_numbers = #tpu.dot_dimension_numbers<[1], [0], [0], [1], [0, 0, 1, 1], [], []>} : vector<512x64xbf16>, vector<64x128xbf16>, vector<512x128xf32> -> vector<512x128xf32>
    %c0_9 = arith.constant 0 : index
    %c0_10 = arith.constant 0 : index
    %11 = vector.load %arg5[%c0_9, %c0_10] : memref<1x128xf32, #tpu.memory_space<vmem>>, vector<1x128xf32>
    %12 = vector.broadcast %11 : vector<1x128xf32> to vector<512x128xf32>
    %13 = arith.addf %10, %12 : vector<512x128xf32>
    %cst_11 = arith.constant 0.000000e+00 : f32
    %14 = vector.broadcast %cst_11 : f32 to vector<512x128xf32>
    %15 = arith.maximumf %13, %14 : vector<512x128xf32>
    %16 = arith.truncf %15 : vector<512x128xf32> to vector<512x128xbf16>
    %c0_12 = arith.constant 0 : index
    %c0_13 = arith.constant 0 : index
    %17 = vector.load %arg6[%c0_12, %c0_13] : memref<128x64xbf16, #tpu.memory_space<vmem>>, vector<128x64xbf16>
    %cst_14 = arith.constant dense<0.000000e+00> : vector<512x64xf32>
    %18 = tpu.matmul %16, %17, %cst_14 {dimension_numbers = #tpu.dot_dimension_numbers<[1], [0], [0], [1], [0, 0, 1, 1], [], []>} : vector<512x128xbf16>, vector<128x64xbf16>, vector<512x64xf32> -> vector<512x64xf32>
    %c0_15 = arith.constant 0 : index
    %c0_16 = arith.constant 0 : index
    %19 = vector.load %arg7[%c0_15, %c0_16] : memref<1x64xf32, #tpu.memory_space<vmem>>, vector<1x64xf32>
    %20 = vector.broadcast %19 : vector<1x64xf32> to vector<512x64xf32>
    %21 = arith.addf %18, %20 : vector<512x64xf32>
    %cst_17 = arith.constant 0.000000e+00 : f32
    %22 = vector.broadcast %cst_17 : f32 to vector<512x64xf32>
    %23 = arith.maximumf %21, %22 : vector<512x64xf32>
    %24 = arith.truncf %23 : vector<512x64xf32> to vector<512x64xbf16>
    %c0_18 = arith.constant 0 : index
    %c0_19 = arith.constant 0 : index
    %25 = vector.load %arg8[%c0_18, %c0_19] : memref<64x128xbf16, #tpu.memory_space<vmem>>, vector<64x128xbf16>
    %cst_20 = arith.constant dense<0.000000e+00> : vector<512x128xf32>
    %26 = tpu.matmul %24, %25, %cst_20 {dimension_numbers = #tpu.dot_dimension_numbers<[1], [0], [0], [1], [0, 0, 1, 1], [], []>} : vector<512x64xbf16>, vector<64x128xbf16>, vector<512x128xf32> -> vector<512x128xf32>
    %c0_21 = arith.constant 0 : index
    %c0_22 = arith.constant 0 : index
    %27 = vector.load %arg9[%c0_21, %c0_22] : memref<1x128xf32, #tpu.memory_space<vmem>>, vector<1x128xf32>
    %28 = vector.broadcast %27 : vector<1x128xf32> to vector<512x128xf32>
    %29 = arith.addf %26, %28 : vector<512x128xf32>
    %cst_23 = arith.constant 0.000000e+00 : f32
    %30 = vector.broadcast %cst_23 : f32 to vector<512x128xf32>
    %31 = arith.maximumf %29, %30 : vector<512x128xf32>
    %c0_24 = arith.constant 0 : index
    %c0_25 = arith.constant 0 : index
    %32 = vector.load %arg11[%c0_24, %c0_25] : memref<512x128xf32, #tpu.memory_space<vmem>>, vector<512x128xf32>
    tpu.vector_store %arg11[%c0_24, %c0_25], %15 {strides = array<i32>} : memref<512x128xf32, #tpu.memory_space<vmem>>, vector<512x128xf32>,
    %c0_26 = arith.constant 0 : index
    %c0_27 = arith.constant 0 : index
    %33 = vector.load %arg10[%c0_26, %c0_27] : memref<512x128xf32, #tpu.memory_space<vmem>>, vector<512x128xf32>
    tpu.vector_store %arg10[%c0_26, %c0_27], %31 {strides = array<i32>} : memref<512x128xf32, #tpu.memory_space<vmem>>, vector<512x128xf32>,
    return
  }
  func.func @transform_0(%arg0: i32) -> (i32, i32) {
    %c0_i32 = arith.constant 0 : i32
    %c0_i32_0 = arith.constant 0 : i32
    return %arg0, %c0_i32 : i32, i32
  }
  func.func @transform_1(%arg0: i32) -> (i32, i32) {
    %c0_i32 = arith.constant 0 : i32
    %c0_i32_0 = arith.constant 0 : i32
    %c0_i32_1 = arith.constant 0 : i32
    return %c0_i32, %c0_i32_0 : i32, i32
  }
  func.func @transform_2(%arg0: i32) -> (i32, i32) {
    %c0_i32 = arith.constant 0 : i32
    %c0_i32_0 = arith.constant 0 : i32
    %c0_i32_1 = arith.constant 0 : i32
    return %c0_i32, %c0_i32_0 : i32, i32
  }
  func.func @transform_3(%arg0: i32) -> (i32, i32) {
    %c0_i32 = arith.constant 0 : i32
    %c0_i32_0 = arith.constant 0 : i32
    %c0_i32_1 = arith.constant 0 : i32
    return %c0_i32, %c0_i32_0 : i32, i32
  }
  func.func @transform_4(%arg0: i32) -> (i32, i32) {
    %c0_i32 = arith.constant 0 : i32
    %c0_i32_0 = arith.constant 0 : i32
    %c0_i32_1 = arith.constant 0 : i32
    return %c0_i32, %c0_i32_0 : i32, i32
  }
  func.func @transform_5(%arg0: i32) -> (i32, i32) {
    %c0_i32 = arith.constant 0 : i32
    %c0_i32_0 = arith.constant 0 : i32
    %c0_i32_1 = arith.constant 0 : i32
    return %c0_i32, %c0_i32_0 : i32, i32
  }
  func.func @transform_6(%arg0: i32) -> (i32, i32) {
    %c0_i32 = arith.constant 0 : i32
    %c0_i32_0 = arith.constant 0 : i32
    %c0_i32_1 = arith.constant 0 : i32
    return %c0_i32, %c0_i32_0 : i32, i32
  }
  func.func @transform_7(%arg0: i32) -> (i32, i32) {
    %c0_i32 = arith.constant 0 : i32
    %c0_i32_0 = arith.constant 0 : i32
    %c0_i32_1 = arith.constant 0 : i32
    return %c0_i32, %c0_i32_0 : i32, i32
  }
  func.func @transform_8(%arg0: i32) -> (i32, i32) {
    %c0_i32 = arith.constant 0 : i32
    %c0_i32_0 = arith.constant 0 : i32
    %c0_i32_1 = arith.constant 0 : i32
    return %c0_i32, %c0_i32_0 : i32, i32
  }
  func.func @transform_9(%arg0: i32) -> (i32, i32) {
    %c0_i32 = arith.constant 0 : i32
    %c0_i32_0 = arith.constant 0 : i32
    return %arg0, %c0_i32 : i32, i32
  }
  func.func @transform_10(%arg0: i32) -> (i32, i32) {
    %c0_i32 = arith.constant 0 : i32
    %c0_i32_0 = arith.constant 0 : i32
    return %arg0, %c0_i32 : i32, i32
  }
}

</mosaic_0001>

<bundles_post_ra>
// kernel: base_autoencoder_forward.1
= control target key start
LH: loop header
LB: loop body
LE: loop exit
PB: predicated region body
PF: predicated region fallthrough
CT: control target
= control target key end

     0   :  { %16 = vsyncpa [#allocation3], 0  ;;  %s4305_s0 = inlined_call_operand.vmem [shape: bf16[1024,128], index: 0, kind: input, shape index: {}]   ;;  %s4306_s1 = inlined_call_operand.vmem [shape: bf16[128,64], index: 1, kind: input, shape index: {}]   ;;  %s4307_s2 = inlined_call_operand.vmem [shape: f32[1,64], index: 2, kind: input, shape index: {}]   ;;  %s4308_s3 = inlined_call_operand.vmem [shape: bf16[64,128], index: 3, kind: input, shape index: {}]   ;;  %s4309_s4 = inlined_call_operand.vmem [shape: f32[1,128], index: 4, kind: input, shape index: {}]   ;;  %s4310_s5 = inlined_call_operand.vmem [shape: bf16[128,64], index: 5, kind: input, shape index: {}]   ;;  %s4311_s6 = inlined_call_operand.vmem [shape: f32[1,64], index: 6, kind: input, shape index: {}]   ;;  %s4312_s7 = inlined_call_operand.vmem [shape: bf16[64,128], index: 7, kind: input, shape index: {}]   ;;  %s4313_s8 = inlined_call_operand.vmem [shape: f32[1,128], index: 8, kind: input, shape index: {}]   ;;  %s4314_s9 = inlined_call_operand.hbm [shape: f32[1024,128], index: 9, kind: output, shape index: {0}]   ;;  %s4315_s10 = inlined_call_operand.vmem [shape: f32[1024,128], index: 10, kind: output, shape index: {1}]  }
   0x1   :  { %18 = vsyncpa [#allocation3 + $0x1], 0  ;;  %s3613_s13 = smov 0   ;;  %s3615_s14 = smov 0  }
   0x2   :  { %s3617_s15 = smov 0   ;;  %s3619_s16 = smov 0  }
   0x3 LB: > { %s3634_s17 = sadd.s32 4294967295, %s3553_s16   ;;  %s2791_s18 = sadd.s32 4294967294, %s3553_s16   ;;  %s3553_s16 = sphi %s3619_s16, %s4321_s16   ;;  %s3549_s15 = sphi %s3617_s15, %s4320_s15   ;;  %s3545_s14 = sphi %s3615_s14, %s4319_s14   ;;  %s3541_s13 = sphi %s3613_s13, %s4318_s13  }
   0x4   : > { %s3638_s19 = sadd.s32 1, %s3553_s16   ;;  %s225_s20 = sadd.s32 1, %s3549_s15 }
   0x5   : > { %s222_s21 = ssub.s32 %s3553_s16, %s3638_s19  ;;  %p235_p0 = scmp.ne.s32.totalorder %s3549_s15, %s3545_s14 }
   0x6   : > { %p223_p1 = scmp.eq.s32.totalorder %s222_s21, 0  ;;  %p236_p2 = scmp.eq.s32.totalorder %s3634_s17, 1 }
   0x7   : > { %p241_p3 = scmp.ne.s32.totalorder %s3545_s14, %s3541_s13  ;;  %p242_p4 = scmp.eq.s32.totalorder %s2791_s18, 1 }
   0x8   : > { %s3649_s22 = scalar_select %p223_p1, %s3549_s15, %s225_s20  }
   0x9   : > { %p3651_p5 = por %p236_p2, %p235_p0  ;;  %p3655_p6 = por %p242_p4, %p241_p3 }
   0xa   : > { %p2794_p7 = scmp.ge.s32.totalorder %s3553_s16, 1  ;;  %p319_p8 = scmp.lt.s32.totalorder %s3553_s16, 3 }
   0xc   : > { %p320_p9 = pnand %p2794_p7, %p319_p8 }
   0xd   : > { %v3435_v0 = vld [vmem:[%s4306_s1] sm:$0xff] (!%p320_p9)   ;;  %s2796_s27 = sshll.u32 (!%p320_p9), %s3634_s17, 6  ;;  %v3436_v1 = vld [vmem:[%s4306_s1 + $0x8] sm:$0xff] (!%p320_p9)   ;;  %v3437_v2 = vld [vmem:[%s4306_s1 + $0x10] sm:$0xff] (!%p320_p9)   ;;  %vm1127_vm0 = vcmask (!%p320_p9), 523264   ;;  %s352_s29 = sand.u32 (!%p320_p9), 1, %s3545_s14  }
   0xe   : > { %323 = sbr.rel (%p320_p9) target bundleno = 1066 (0x42a), region = 56  ;;  %p363_p10 = scmp.lt.s32.totalorder (!%p320_p9), %s2796_s27, 127  ;;  %3082 = vmatprep.subr.bf16.mxu0 (!%p320_p9), %v3435_v0  ;;  %v3438_v3 = vld [vmem:[%s4306_s1 + $0x18] sm:$0xff] (!%p320_p9)   ;;  %v3439_v5 = vld [vmem:[%s4306_s1 + $0x20] sm:$0xff] (!%p320_p9)   ;;  %v3440_v6 = vld [vmem:[%s4306_s1 + $0x28] sm:$0xff] (!%p320_p9)  }
   0xf   : > { %3083 = vmatpush3.bf16.msra.mxu0 (!%p320_p9), %v3435_v0  ;;  %v3441_v7 = vld [vmem:[%s4306_s1 + $0x30] sm:$0xff] (!%p320_p9)   ;;  %v3442_v8 = vld [vmem:[%s4306_s1 + $0x38] sm:$0xff] (!%p320_p9)   ;;  %v3475_v13 = vld [vmem:[%s4308_s3] sm:$0xff] (!%p320_p9)  }
  0x10   : > { %3084 = vmatprep.subr.bf16.mxu0 (!%p320_p9), %v3436_v1  ;;  %v3476_v14 = vld [vmem:[%s4308_s3 + $0x8] sm:$0xff] (!%p320_p9)   ;;  %3162 = vmatprep.subr.bf16.mxu1 (!%p320_p9), %v3475_v13  ;;  %v3477_v34 = vld [vmem:[%s4308_s3 + $0x10] sm:$0xff] (!%p320_p9)   ;;  %v3478_v36 = vld [vmem:[%s4308_s3 + $0x18] sm:$0xff] (!%p320_p9)  }
  0x11   : > { %3163 = vmatpush3.bf16.msra.mxu1 (!%p320_p9), %v3475_v13  ;;  %v3479_v44 = vld [vmem:[%s4310_s5] sm:$0xff] (!%p320_p9)   ;;  %v3480_v63 = vld [vmem:[%s4310_s5 + $0x8] sm:$0xff] (!%p320_p9)  }
  0x12   : > { %3164 = vmatprep.subr.bf16.mxu1 (!%p320_p9), %v3476_v14  ;;  %v3744_v45 = vld [vmem:[%s4307_s2] ss:$0 sm:$0xff] (!%p320_p9) }
  0x13   : > { %3085 = vmatpush3.bf16.msra.mxu0 (!%p320_p9), %v3436_v1 }
  0x14   : > { %3086 = vmatprep.subr.bf16.mxu0 (!%p320_p9), %v3437_v2 }
  0x15   : > { %s4323_s27 = smov (!%p363_p10, %s2796_s27), 127  ;;  %3165 = vmatpush3.bf16.msra.mxu1 %v3476_v14 }
  0x16   : > { %s2797_s12 = sshll.u32 %s4323_s27, 2  ;;  %3166 = vmatprep.subr.bf16.mxu1 %v3477_v34  ;;  %s2799_s28 = sshll.u32 %s4323_s27, 3 }
  0x17   : > { %s3677_s21 = scalar_lea.vmem %s4305_s0, %s2797_s12  ;;  %3087 = vmatpush3.bf16.msra.mxu0 %v3437_v2  ;;  %s3876_s30 = scalar_lea.vmem %s4315_s10, %s2799_s28 }
  0x18   : > { %v3443_v4 = vld [vmem:[%s3677_s21] sm:$0xff]   ;;  %3088 = vmatprep.subr.bf16.mxu0 %v3438_v3  ;;  %v3444_v9 = vld [vmem:[%s3677_s21 + $0x8] sm:$0xff]   ;;  %v3445_v10 = vld [vmem:[%s3677_s21 + $0x10] sm:$0xff]   ;;  %s2795_s27 = sshll.u32 %s352_s29, 9  ;;  %s2929_s12 = sshll.u32 %s3634_s17, 13 }
  0x19   : > { %3098 = vmatprep.mubr.bf16.mxu0 %v3443_v4  ;;  %v3446_v11 = vld [vmem:[%s3677_s21 + $0x18] sm:$0xff]   ;;  %v3447_v12 = vld [vmem:[%s3677_s21 + $0x20] sm:$0xff]   ;;  %v3448_v15 = vld [vmem:[%s3677_s21 + $0x28] sm:$0xff]   ;;  %3167 = vmatpush3.bf16.msra.mxu1 %v3477_v34  ;;  %s4127_s11 = scalar_lea.vmem [#allocation2], %s2795_s27  ;;  %s4255_s26 = scalar_lea.hbm %s4314_s9, %s2929_s12 }
  0x1a   : > { %v3449_v16 = vld [vmem:[%s3677_s21 + $0x30] sm:$0xff]   ;;  %v3450_v17 = vld [vmem:[%s3677_s21 + $0x38] sm:$0xff]   ;;  %v3451_v18 = vld [vmem:[%s3677_s21 + $0x40] sm:$0xff]   ;;  %3168 = vmatprep.subr.bf16.mxu1 %v3478_v36  ;;  %s2700_s18 = sshll.u32 %s4127_s11, 4  ;;  %s4264_s17 = scalar_lea.sflag [#allocation3], %s352_s29  ;;  %s4257_s18 = int_to_ptr.vmem [resolvable:$true] %s2700_s18 }
  0x1b   : > { %3089 = vmatpush3.bf16.msra.mxu0 %v3438_v3  ;;  %v3452_v19 = vld [vmem:[%s3677_s21 + $0x48] sm:$0xff]   ;;  %v3453_v20 = vld [vmem:[%s3677_s21 + $0x50] sm:$0xff]   ;;  %v3454_v21 = vld [vmem:[%s3677_s21 + $0x58] sm:$0xff]   ;;  %s3491_s28 = scalar_lea.vmem %s4257_s18, 8192 }
  0x1c   : > { %3090 = vmatprep.subr.bf16.mxu0 %v3439_v5  ;;  %v3455_v22 = vld [vmem:[%s3677_s21 + $0x60] sm:$0xff]   ;;  %v3456_v23 = vld [vmem:[%s3677_s21 + $0x68] sm:$0xff]   ;;  %v3457_v24 = vld [vmem:[%s3677_s21 + $0x70] sm:$0xff]   ;;  %p3492_p11 = scmp.ne.s32.totalorder %s4257_s18, %s3491_s28 }
  0x1d   : > { %v3458_v25 = vld [vmem:[%s3677_s21 + $0x78] sm:$0xff]   ;;  %v3459_v26 = vld [vmem:[%s3677_s21 + $0x80] sm:$0xff]   ;;  %v3460_v27 = vld [vmem:[%s3677_s21 + $0x88] sm:$0xff]   ;;  %3169 = vmatpush3.bf16.msra.mxu1 %v3478_v36 }
  0x1e   : > { %v3461_v28 = vld [vmem:[%s3677_s21 + $0x90] sm:$0xff]   ;;  %v3462_v29 = vld [vmem:[%s3677_s21 + $0x98] sm:$0xff]   ;;  %v3463_v30 = vld [vmem:[%s3677_s21 + $0xa0] sm:$0xff]   ;;  %3234 = vmatprep.subr.bf16.mxu1 %v3479_v44  ;;  %p3493_p12 = pnand %p3492_p11, %p3651_p5 }
  0x1f   : > { %3091 = vmatpush3.bf16.msra.mxu0 %v3439_v5  ;;  %v3464_v31 = vld [vmem:[%s3677_s21 + $0xa8] sm:$0xff]   ;;  %v3465_v32 = vld [vmem:[%s3677_s21 + $0xb0] sm:$0xff]   ;;  %v3466_v33 = vld [vmem:[%s3677_s21 + $0xb8] sm:$0xff]  }
  0x20   : > { %3092 = vmatprep.subr.bf16.mxu0 %v3440_v6  ;;  %v3467_v35 = vld [vmem:[%s3677_s21 + $0xc0] sm:$0xff]   ;;  %v3468_v37 = vld [vmem:[%s3677_s21 + $0xc8] sm:$0xff]   ;;  %v3469_v38 = vld [vmem:[%s3677_s21 + $0xd0] sm:$0xff]   ;;  %p3494_p13 = pneg %p3493_p12 }
  0x21   : > { %v3470_v39 = vld [vmem:[%s3677_s21 + $0xd8] sm:$0xff]   ;;  %v3471_v40 = vld [vmem:[%s3677_s21 + $0xe0] sm:$0xff]   ;;  %v3472_v41 = vld [vmem:[%s3677_s21 + $0xe8] sm:$0xff]  }
  0x22   : > { %v3473_v42 = vld [vmem:[%s3677_s21 + $0xf0] sm:$0xff]   ;;  %v3474_v43 = vld [vmem:[%s3677_s21 + $0xf8] sm:$0xff]   ;;  %s3555_s21 = smov [#allocation2]  }
  0x23   : > { %3093 = vmatpush3.bf16.msra.mxu0 %v3440_v6 }
  0x24   : > { %3094 = vmatprep.subr.bf16.mxu0 %v3441_v7 }
  0x27   : > { %3095 = vmatpush3.bf16.msra.mxu0 %v3441_v7  ;;  %v3481_v7 = vld [vmem:[%s4310_s5 + $0x10] sm:$0xff]  }
  0x28   : > { %3096 = vmatprep.subr.bf16.mxu0 %v3442_v8 }
  0x2b   : > { %3097 = vmatpush3.bf16.msra.mxu0 %v3442_v8 }
  0x2e   : > { %3099 = vmatmul.mubr.bf16.vlgmr.msra.gmra.mrb[0].mxu0 %v3444_v9 }
  0x2f   : > { %3102 = vmatprep.mubr.bf16.mxu0 %v3445_v10 }
  0x36   : > { %3103 = vmatmul.mubr.bf16.gmra.mrb[4].mxu0 %v3446_v11 }
  0x37   : > { %3106 = vmatprep.mubr.bf16.mxu0 %v3447_v12 }
  0x3e   : > { %3107 = vmatmul.mubr.bf16.gmra.mrb[8].mxu0 %v3448_v15  ;;  %v3482_v15 = vld [vmem:[%s4310_s5 + $0x18] sm:$0xff]  }
  0x3f   : > { %3110 = vmatprep.mubr.bf16.mxu0 %v3449_v16 }
  0x46   : > { %3111 = vmatmul.mubr.bf16.gmra.mrb[12].mxu0 %v3450_v17 }
  0x47   : > { %3114 = vmatprep.mubr.bf16.mxu0 %v3451_v18 }
  0x4e   : > { %3115 = vmatmul.mubr.bf16.gmra.mrb[16].mxu0 %v3452_v19 }
  0x4f   : > { %3118 = vmatprep.mubr.bf16.mxu0 %v3453_v20 }
  0x56   : > { %3119 = vmatmul.mubr.bf16.gmra.mrb[20].mxu0 %v3454_v21 }
  0x57   : > { %3122 = vmatprep.mubr.bf16.mxu0 %v3455_v22 }
  0x5e   : > { %3123 = vmatmul.mubr.bf16.gmra.mrb[24].mxu0 %v3456_v23  ;;  %v3483_v23 = vld [vmem:[%s4310_s5 + $0x20] sm:$0xff]  }
  0x5f   : > { %3126 = vmatprep.mubr.bf16.mxu0 %v3457_v24 }
  0x66   : > { %3127 = vmatmul.mubr.bf16.gmra.mrb[28].mxu0 %v3458_v25 }
  0x67   : > { %3130 = vmatprep.mubr.bf16.mxu0 %v3459_v26 }
  0x6e   : > { %3131 = vmatmul.mubr.bf16.gmra.mrb[32].mxu0 %v3460_v27 }
  0x6f   : > { %3134 = vmatprep.mubr.bf16.mxu0 %v3461_v28 }
  0x76   : > { %3135 = vmatmul.mubr.bf16.gmra.mrb[36].mxu0 %v3462_v29 }
  0x77   : > { %3138 = vmatprep.mubr.bf16.mxu0 %v3463_v30 }
  0x7e   : > { %3139 = vmatmul.mubr.bf16.gmra.mrb[40].mxu0 %v3464_v31  ;;  %v3484_v31 = vld [vmem:[%s4310_s5 + $0x28] sm:$0xff]  }
  0x7f   : > { %3142 = vmatprep.mubr.bf16.mxu0 %v3465_v32 }
  0x86   : > { %3143 = vmatmul.mubr.bf16.gmra.mrb[44].mxu0 %v3466_v33 }
  0x87   : > { %3146 = vmatprep.mubr.bf16.mxu0 %v3467_v35 }
  0x8e   : > { %3147 = vmatmul.mubr.bf16.gmra.mrb[48].mxu0 %v3468_v37 }
  0x8f   : > { %3150 = vmatprep.mubr.bf16.mxu0 %v3469_v38 }
  0x96   : > { %3151 = vmatmul.mubr.bf16.gmra.mrb[52].mxu0 %v3470_v39  ;;  %v3485_v39 = vld [vmem:[%s4310_s5 + $0x30] sm:$0xff]  }
  0x97   : > { %3154 = vmatprep.mubr.bf16.mxu0 %v3471_v40 }
  0x9e   : > { %3155 = vmatmul.mubr.bf16.gmra.mrb[56].mxu0 %v3472_v41 }
  0x9f   : > { %3158 = vmatprep.mubr.bf16.mxu0 %v3473_v42 }
  0xa6   : > { %3159 = vmatmul.mubr.bf16.gmra.mrb[60].mxu0 %v3474_v43 }
 0x101   : > { %v3100_v46 = vpop.f32.mrb[0].mxu0 }
 0x102   : > { %v746_v47 = vadd.f32 %v3100_v46, %v3744_v45  ;;  %v737_v48 = vpop.f32.mrb[1].mxu0 }
 0x103   : > { %v738_v49 = vadd.f32 %v3744_v45, %v737_v48  ;;  %v3101_v50 = vpop.f32.mrb[2].mxu0  ;;  %v3486_v48 = vld [vmem:[%s4310_s5 + $0x38] sm:$0xff]  }
 0x104   : > { %v749_v51 = vadd.f32 %v3101_v50, %v3744_v45  ;;  %v740_v52 = vpop.f32.mrb[3].mxu0  ;;  %v994_v54 = vmax.f32 %v746_v47, 0.0 }
 0x105   : > { %v741_v53 = vadd.f32 %v3744_v45, %v740_v52  ;;  %v992_v56 = vmax.f32 %v738_v49, 0.0 }
 0x106   : > { %v995_v55 = vmax.f32 %v749_v51, 0.0 }
 0x107   : > { %v993_v57 = vmax.f32 %v741_v53, 0.0 }
 0x108   : > { %v1057_v58 = vpack.c.bf16 %v995_v55, %v994_v54 }
 0x109   : > { %v3104_v59 = vpop.f32.mrb[4].mxu0  ;;  %v1056_v60 = vpack.c.bf16 %v993_v57, %v992_v56 }
 0x10a   : > { %v762_v61 = vadd.f32 %v3104_v59, %v3744_v45  ;;  %v753_v62 = vpop.f32.mrb[5].mxu0 }
 0x10b   : > { %v754_v0 = vadd.f32 %v3744_v45, %v753_v62  ;;  %v3105_v1 = vpop.f32.mrb[6].mxu0  ;;  %3170 = vmatprep.mubr.msk.bf16.mxu1 %vm1127_vm0, %v1056_v60 }
 0x10c   : > { %v765_v2 = vadd.f32 %v3105_v1, %v3744_v45  ;;  %v756_v3 = vpop.f32.mrb[7].mxu0  ;;  %3171 = vmatmul.mubr.msk.bf16.vlgmr.msra.gmra.mrb[0].mxu1 %vm1127_vm0, %v1057_v58  ;;  %v998_v5 = vmax.f32 %v762_v61, 0.0 }
 0x10d   : > { %v757_v4 = vadd.f32 %v3744_v45, %v756_v3  ;;  %3235 = vmatpush3.bf16.msra.mxu1 %v3479_v44  ;;  %v996_v8 = vmax.f32 %v754_v0, 0.0 }
 0x10e   : > { %v999_v6 = vmax.f32 %v765_v2, 0.0  ;;  %3236 = vmatprep.subr.bf16.mxu1 %v3480_v63 }
 0x10f   : > { %v997_v9 = vmax.f32 %v757_v4, 0.0 }
 0x110   : > { %v1059_v10 = vpack.c.bf16 %v999_v6, %v998_v5 }
 0x111   : > { %v1058_v11 = vpack.c.bf16 %v997_v9, %v996_v8  ;;  %v3108_v12 = vpop.f32.mrb[8].mxu0  ;;  %3237 = vmatpush3.bf16.msra.mxu1 %v3480_v63 }
 0x112   : > { %v778_v13 = vadd.f32 %v3108_v12, %v3744_v45  ;;  %v769_v14 = vpop.f32.mrb[9].mxu0  ;;  %3238 = vmatprep.subr.bf16.mxu1 %v3481_v7 }
 0x113   : > { %v770_v16 = vadd.f32 %v3744_v45, %v769_v14  ;;  %v3109_v17 = vpop.f32.mrb[10].mxu0  ;;  %3174 = vmatprep.mubr.msk.bf16.mxu1 %vm1127_vm0, %v1058_v11 }
 0x114   : > { %v781_v18 = vadd.f32 %v3109_v17, %v3744_v45  ;;  %v772_v19 = vpop.f32.mrb[11].mxu0  ;;  %3175 = vmatmul.mubr.msk.bf16.gmra.mrb[4].mxu1 %vm1127_vm0, %v1059_v10  ;;  %v1002_v21 = vmax.f32 %v778_v13, 0.0 }
 0x115   : > { %v773_v20 = vadd.f32 %v3744_v45, %v772_v19  ;;  %3239 = vmatpush3.bf16.msra.mxu1 %v3481_v7  ;;  %v1000_v24 = vmax.f32 %v770_v16, 0.0 }
 0x116   : > { %v1003_v22 = vmax.f32 %v781_v18, 0.0  ;;  %3240 = vmatprep.subr.bf16.mxu1 %v3482_v15 }
 0x117   : > { %v1001_v25 = vmax.f32 %v773_v20, 0.0 }
 0x118   : > { %v1061_v26 = vpack.c.bf16 %v1003_v22, %v1002_v21 }
 0x119   : > { %v1060_v27 = vpack.c.bf16 %v1001_v25, %v1000_v24  ;;  %v3112_v28 = vpop.f32.mrb[12].mxu0  ;;  %3241 = vmatpush3.bf16.msra.mxu1 %v3482_v15 }
 0x11a   : > { %v794_v29 = vadd.f32 %v3112_v28, %v3744_v45  ;;  %v785_v30 = vpop.f32.mrb[13].mxu0  ;;  %3242 = vmatprep.subr.bf16.mxu1 %v3483_v23 }
 0x11b   : > { %v786_v32 = vadd.f32 %v3744_v45, %v785_v30  ;;  %v3113_v33 = vpop.f32.mrb[14].mxu0  ;;  %3178 = vmatprep.mubr.msk.bf16.mxu1 %vm1127_vm0, %v1060_v27 }
 0x11c   : > { %v797_v34 = vadd.f32 %v3113_v33, %v3744_v45  ;;  %v788_v35 = vpop.f32.mrb[15].mxu0  ;;  %3179 = vmatmul.mubr.msk.bf16.gmra.mrb[8].mxu1 %vm1127_vm0, %v1061_v26  ;;  %v1006_v37 = vmax.f32 %v794_v29, 0.0 }
 0x11d   : > { %v789_v36 = vadd.f32 %v3744_v45, %v788_v35  ;;  %3243 = vmatpush3.bf16.msra.mxu1 %v3483_v23  ;;  %v1004_v40 = vmax.f32 %v786_v32, 0.0 }
 0x11e   : > { %v1007_v38 = vmax.f32 %v797_v34, 0.0  ;;  %3244 = vmatprep.subr.bf16.mxu1 %v3484_v31 }
 0x11f   : > { %v1005_v41 = vmax.f32 %v789_v36, 0.0 }
 0x120   : > { %v1063_v42 = vpack.c.bf16 %v1007_v38, %v1006_v37 }
 0x121   : > { %v1062_v43 = vpack.c.bf16 %v1005_v41, %v1004_v40  ;;  %v3116_v44 = vpop.f32.mrb[16].mxu0  ;;  %3245 = vmatpush3.bf16.msra.mxu1 %v3484_v31 }
 0x122   : > { %v810_v46 = vadd.f32 %v3116_v44, %v3744_v45  ;;  %v801_v47 = vpop.f32.mrb[17].mxu0  ;;  %3246 = vmatprep.subr.bf16.mxu1 %v3485_v39 }
 0x123   : > { %v802_v49 = vadd.f32 %v3744_v45, %v801_v47  ;;  %v3117_v50 = vpop.f32.mrb[18].mxu0  ;;  %3182 = vmatprep.mubr.msk.bf16.mxu1 %vm1127_vm0, %v1062_v43 }
 0x124   : > { %v813_v51 = vadd.f32 %v3117_v50, %v3744_v45  ;;  %v804_v52 = vpop.f32.mrb[19].mxu0  ;;  %3183 = vmatmul.mubr.msk.bf16.gmra.mrb[12].mxu1 %vm1127_vm0, %v1063_v42  ;;  %v1010_v54 = vmax.f32 %v810_v46, 0.0 }
 0x125   : > { %v805_v53 = vadd.f32 %v3744_v45, %v804_v52  ;;  %3247 = vmatpush3.bf16.msra.mxu1 %v3485_v39  ;;  %v1008_v56 = vmax.f32 %v802_v49, 0.0 }
 0x126   : > { %v1011_v55 = vmax.f32 %v813_v51, 0.0  ;;  %3248 = vmatprep.subr.bf16.mxu1 %v3486_v48 }
 0x127   : > { %v1009_v57 = vmax.f32 %v805_v53, 0.0 }
 0x128   : > { %v1065_v58 = vpack.c.bf16 %v1011_v55, %v1010_v54 }
 0x129   : > { %v1064_v59 = vpack.c.bf16 %v1009_v57, %v1008_v56  ;;  %v3120_v60 = vpop.f32.mrb[20].mxu0  ;;  %3249 = vmatpush3.bf16.msra.mxu1 %v3486_v48 }
 0x12a   : > { %v826_v61 = vadd.f32 %v3120_v60, %v3744_v45  ;;  %v817_v62 = vpop.f32.mrb[21].mxu0 }
 0x12b   : > { %v818_v63 = vadd.f32 %v3744_v45, %v817_v62  ;;  %v3121_v0 = vpop.f32.mrb[22].mxu0  ;;  %3186 = vmatprep.mubr.msk.bf16.mxu1 %vm1127_vm0, %v1064_v59 }
 0x12c   : > { %v829_v1 = vadd.f32 %v3121_v0, %v3744_v45  ;;  %v820_v2 = vpop.f32.mrb[23].mxu0  ;;  %3187 = vmatmul.mubr.msk.bf16.gmra.mrb[16].mxu1 %vm1127_vm0, %v1065_v58  ;;  %v1014_v4 = vmax.f32 %v826_v61, 0.0 }
 0x12d   : > { %v821_v3 = vadd.f32 %v3744_v45, %v820_v2  ;;  %v1012_v6 = vmax.f32 %v818_v63, 0.0 }
 0x12e   : > { %v1015_v5 = vmax.f32 %v829_v1, 0.0 }
 0x12f   : > { %v1013_v7 = vmax.f32 %v821_v3, 0.0 }
 0x130   : > { %v1067_v8 = vpack.c.bf16 %v1015_v5, %v1014_v4 }
 0x131   : > { %v1066_v9 = vpack.c.bf16 %v1013_v7, %v1012_v6  ;;  %v3124_v10 = vpop.f32.mrb[24].mxu0 }
 0x132   : > { %v842_v11 = vadd.f32 %v3124_v10, %v3744_v45  ;;  %v833_v12 = vpop.f32.mrb[25].mxu0 }
 0x133   : > { %v834_v13 = vadd.f32 %v3744_v45, %v833_v12  ;;  %v3125_v14 = vpop.f32.mrb[26].mxu0  ;;  %3190 = vmatprep.mubr.msk.bf16.mxu1 %vm1127_vm0, %v1066_v9 }
 0x134   : > { %v845_v15 = vadd.f32 %v3125_v14, %v3744_v45  ;;  %v836_v16 = vpop.f32.mrb[27].mxu0  ;;  %3191 = vmatmul.mubr.msk.bf16.gmra.mrb[20].mxu1 %vm1127_vm0, %v1067_v8  ;;  %v1018_v18 = vmax.f32 %v842_v11, 0.0 }
 0x135   : > { %v837_v17 = vadd.f32 %v3744_v45, %v836_v16  ;;  %v1016_v20 = vmax.f32 %v834_v13, 0.0 }
 0x136   : > { %v1019_v19 = vmax.f32 %v845_v15, 0.0 }
 0x137   : > { %v1017_v21 = vmax.f32 %v837_v17, 0.0 }
 0x138   : > { %v1069_v22 = vpack.c.bf16 %v1019_v19, %v1018_v18 }
 0x139   : > { %v1068_v23 = vpack.c.bf16 %v1017_v21, %v1016_v20  ;;  %v3128_v24 = vpop.f32.mrb[28].mxu0 }
 0x13a   : > { %v858_v25 = vadd.f32 %v3128_v24, %v3744_v45  ;;  %v849_v26 = vpop.f32.mrb[29].mxu0 }
 0x13b   : > { %v850_v27 = vadd.f32 %v3744_v45, %v849_v26  ;;  %v3129_v28 = vpop.f32.mrb[30].mxu0  ;;  %3194 = vmatprep.mubr.msk.bf16.mxu1 %vm1127_vm0, %v1068_v23 }
 0x13c   : > { %v861_v29 = vadd.f32 %v3129_v28, %v3744_v45  ;;  %v852_v30 = vpop.f32.mrb[31].mxu0  ;;  %3195 = vmatmul.mubr.msk.bf16.gmra.mrb[24].mxu1 %vm1127_vm0, %v1069_v22  ;;  %v1022_v32 = vmax.f32 %v858_v25, 0.0 }
 0x13d   : > { %v853_v31 = vadd.f32 %v3744_v45, %v852_v30  ;;  %v1020_v34 = vmax.f32 %v850_v27, 0.0 }
 0x13e   : > { %v1023_v33 = vmax.f32 %v861_v29, 0.0 }
 0x13f   : > { %v1021_v35 = vmax.f32 %v853_v31, 0.0 }
 0x140   : > { %v1071_v36 = vpack.c.bf16 %v1023_v33, %v1022_v32 }
 0x141   : > { %v1070_v37 = vpack.c.bf16 %v1021_v35, %v1020_v34  ;;  %v3132_v38 = vpop.f32.mrb[32].mxu0 }
 0x142   : > { %v874_v39 = vadd.f32 %v3132_v38, %v3744_v45  ;;  %v865_v40 = vpop.f32.mrb[33].mxu0 }
 0x143   : > { %v866_v41 = vadd.f32 %v3744_v45, %v865_v40  ;;  %v3133_v42 = vpop.f32.mrb[34].mxu0  ;;  %3198 = vmatprep.mubr.msk.bf16.mxu1 %vm1127_vm0, %v1070_v37 }
 0x144   : > { %v877_v43 = vadd.f32 %v3133_v42, %v3744_v45  ;;  %v868_v44 = vpop.f32.mrb[35].mxu0  ;;  %3199 = vmatmul.mubr.msk.bf16.gmra.mrb[28].mxu1 %vm1127_vm0, %v1071_v36  ;;  %v1026_v47 = vmax.f32 %v874_v39, 0.0 }
 0x145   : > { %v869_v46 = vadd.f32 %v3744_v45, %v868_v44  ;;  %v1024_v49 = vmax.f32 %v866_v41, 0.0 }
 0x146   : > { %v1027_v48 = vmax.f32 %v877_v43, 0.0 }
 0x147   : > { %v1025_v50 = vmax.f32 %v869_v46, 0.0 }
 0x148   : > { %v1073_v51 = vpack.c.bf16 %v1027_v48, %v1026_v47 }
 0x149   : > { %v1072_v52 = vpack.c.bf16 %v1025_v50, %v1024_v49  ;;  %v3136_v53 = vpop.f32.mrb[36].mxu0 }
 0x14a   : > { %v890_v54 = vadd.f32 %v3136_v53, %v3744_v45  ;;  %v881_v55 = vpop.f32.mrb[37].mxu0 }
 0x14b   : > { %v882_v56 = vadd.f32 %v3744_v45, %v881_v55  ;;  %v3137_v57 = vpop.f32.mrb[38].mxu0  ;;  %3202 = vmatprep.mubr.msk.bf16.mxu1 %vm1127_vm0, %v1072_v52 }
 0x14c   : > { %v893_v58 = vadd.f32 %v3137_v57, %v3744_v45  ;;  %v884_v59 = vpop.f32.mrb[39].mxu0  ;;  %3203 = vmatmul.mubr.msk.bf16.gmra.mrb[32].mxu1 %vm1127_vm0, %v1073_v51  ;;  %v1030_v61 = vmax.f32 %v890_v54, 0.0 }
 0x14d   : > { %v885_v60 = vadd.f32 %v3744_v45, %v884_v59  ;;  %v1028_v63 = vmax.f32 %v882_v56, 0.0 }
 0x14e   : > { %v1031_v62 = vmax.f32 %v893_v58, 0.0 }
 0x14f   : > { %v1029_v0 = vmax.f32 %v885_v60, 0.0 }
 0x150   : > { %v1075_v1 = vpack.c.bf16 %v1031_v62, %v1030_v61 }
 0x151   : > { %v1074_v2 = vpack.c.bf16 %v1029_v0, %v1028_v63  ;;  %v3140_v3 = vpop.f32.mrb[40].mxu0 }
 0x152   : > { %v906_v4 = vadd.f32 %v3140_v3, %v3744_v45  ;;  %v897_v5 = vpop.f32.mrb[41].mxu0 }
 0x153   : > { %v898_v6 = vadd.f32 %v3744_v45, %v897_v5  ;;  %v3141_v7 = vpop.f32.mrb[42].mxu0  ;;  %3206 = vmatprep.mubr.msk.bf16.mxu1 %vm1127_vm0, %v1074_v2 }
 0x154   : > { %v909_v8 = vadd.f32 %v3141_v7, %v3744_v45  ;;  %v900_v9 = vpop.f32.mrb[43].mxu0  ;;  %3207 = vmatmul.mubr.msk.bf16.gmra.mrb[36].mxu1 %vm1127_vm0, %v1075_v1  ;;  %v1034_v11 = vmax.f32 %v906_v4, 0.0 }
 0x155   : > { %v901_v10 = vadd.f32 %v3744_v45, %v900_v9  ;;  %v1032_v13 = vmax.f32 %v898_v6, 0.0 }
 0x156   : > { %v1035_v12 = vmax.f32 %v909_v8, 0.0 }
 0x157   : > { %v1033_v14 = vmax.f32 %v901_v10, 0.0 }
 0x158   : > { %v1077_v15 = vpack.c.bf16 %v1035_v12, %v1034_v11 }
 0x159   : > { %v1076_v16 = vpack.c.bf16 %v1033_v14, %v1032_v13  ;;  %v3144_v17 = vpop.f32.mrb[44].mxu0 }
 0x15a   : > { %v922_v18 = vadd.f32 %v3144_v17, %v3744_v45  ;;  %v913_v19 = vpop.f32.mrb[45].mxu0 }
 0x15b   : > { %v914_v20 = vadd.f32 %v3744_v45, %v913_v19  ;;  %v3145_v21 = vpop.f32.mrb[46].mxu0  ;;  %3210 = vmatprep.mubr.msk.bf16.mxu1 %vm1127_vm0, %v1076_v16 }
 0x15c   : > { %v925_v22 = vadd.f32 %v3145_v21, %v3744_v45  ;;  %v916_v23 = vpop.f32.mrb[47].mxu0  ;;  %3211 = vmatmul.mubr.msk.bf16.gmra.mrb[40].mxu1 %vm1127_vm0, %v1077_v15  ;;  %v1038_v25 = vmax.f32 %v922_v18, 0.0 }
 0x15d   : > { %v917_v24 = vadd.f32 %v3744_v45, %v916_v23  ;;  %v1036_v27 = vmax.f32 %v914_v20, 0.0 }
 0x15e   : > { %v1039_v26 = vmax.f32 %v925_v22, 0.0 }
 0x15f   : > { %v1037_v28 = vmax.f32 %v917_v24, 0.0  ;;  %v3487_v24 = vld [vmem:[%s4312_s7] sm:$0xff]  }
 0x160   : > { %v1079_v29 = vpack.c.bf16 %v1039_v26, %v1038_v25  ;;  %3314 = vmatprep.subr.bf16.mxu0 %v3487_v24  ;;  %3386 = vmatprep.subr.bf16.mxu1 %v3487_v24 }
 0x161   : > { %v1078_v30 = vpack.c.bf16 %v1037_v28, %v1036_v27  ;;  %v3148_v31 = vpop.f32.mrb[48].mxu0  ;;  %3315 = vmatpush3.bf16.msra.mxu0 %v3487_v24 }
 0x162   : > { %v938_v32 = vadd.f32 %v3148_v31, %v3744_v45  ;;  %v929_v33 = vpop.f32.mrb[49].mxu0 }
 0x163   : > { %v930_v34 = vadd.f32 %v3744_v45, %v929_v33  ;;  %v3149_v35 = vpop.f32.mrb[50].mxu0  ;;  %3214 = vmatprep.mubr.msk.bf16.mxu1 %vm1127_vm0, %v1078_v30  ;;  %v3488_v33 = vld [vmem:[%s4312_s7 + $0x8] sm:$0xff]  }
 0x164   : > { %v941_v36 = vadd.f32 %v3149_v35, %v3744_v45  ;;  %v932_v37 = vpop.f32.mrb[51].mxu0  ;;  %3215 = vmatmul.mubr.msk.bf16.gmra.mrb[44].mxu1 %vm1127_vm0, %v1079_v29  ;;  %v1042_v39 = vmax.f32 %v938_v32, 0.0  ;;  %3316 = vmatprep.subr.bf16.mxu0 %v3488_v33 }
 0x165   : > { %v933_v38 = vadd.f32 %v3744_v45, %v932_v37  ;;  %v1040_v41 = vmax.f32 %v930_v34, 0.0  ;;  %v3489_v34 = vld [vmem:[%s4312_s7 + $0x10] sm:$0xff]   ;;  %3317 = vmatpush3.bf16.msra.mxu0 %v3488_v33 }
 0x166   : > { %v1043_v40 = vmax.f32 %v941_v36, 0.0  ;;  %3318 = vmatprep.subr.bf16.mxu0 %v3489_v34 }
 0x167   : > { %v1041_v42 = vmax.f32 %v933_v38, 0.0 }
 0x168   : > { %v1081_v43 = vpack.c.bf16 %v1043_v40, %v1042_v39  ;;  %v3490_v40 = vld [vmem:[%s4312_s7 + $0x18] sm:$0xff]  }
 0x169   : > { %v1080_v44 = vpack.c.bf16 %v1041_v42, %v1040_v41  ;;  %v3152_v46 = vpop.f32.mrb[52].mxu0  ;;  %3319 = vmatpush3.bf16.msra.mxu0 %v3489_v34 }
 0x16a   : > { %v954_v47 = vadd.f32 %v3152_v46, %v3744_v45  ;;  %v945_v48 = vpop.f32.mrb[53].mxu0  ;;  %3320 = vmatprep.subr.bf16.mxu0 %v3490_v40 }
 0x16b   : > { %v946_v49 = vadd.f32 %v3744_v45, %v945_v48  ;;  %v3153_v50 = vpop.f32.mrb[54].mxu0  ;;  %3218 = vmatprep.mubr.msk.bf16.mxu1 %vm1127_vm0, %v1080_v44 }
 0x16c   : > { %v957_v51 = vadd.f32 %v3153_v50, %v3744_v45  ;;  %v948_v52 = vpop.f32.mrb[55].mxu0  ;;  %3219 = vmatmul.mubr.msk.bf16.gmra.mrb[48].mxu1 %vm1127_vm0, %v1081_v43  ;;  %v1046_v54 = vmax.f32 %v954_v47, 0.0 }
 0x16d   : > { %v949_v53 = vadd.f32 %v3744_v45, %v948_v52  ;;  %v1044_v56 = vmax.f32 %v946_v49, 0.0  ;;  %3321 = vmatpush3.bf16.msra.mxu0 %v3490_v40 }
 0x16e   : > { %v1047_v55 = vmax.f32 %v957_v51, 0.0 }
 0x16f   : > { %v1045_v57 = vmax.f32 %v949_v53, 0.0 }
 0x170   : > { %v1083_v58 = vpack.c.bf16 %v1047_v55, %v1046_v54 }
 0x171   : > { %v1082_v59 = vpack.c.bf16 %v1045_v57, %v1044_v56  ;;  %v3156_v60 = vpop.f32.mrb[56].mxu0 }
 0x172   : > { %v970_v61 = vadd.f32 %v3156_v60, %v3744_v45  ;;  %v961_v62 = vpop.f32.mrb[57].mxu0 }
 0x173   : > { %v962_v63 = vadd.f32 %v3744_v45, %v961_v62  ;;  %v3157_v0 = vpop.f32.mrb[58].mxu0  ;;  %3222 = vmatprep.mubr.msk.bf16.mxu1 %vm1127_vm0, %v1082_v59 }
 0x174   : > { %v973_v1 = vadd.f32 %v3157_v0, %v3744_v45  ;;  %v964_v2 = vpop.f32.mrb[59].mxu0  ;;  %3223 = vmatmul.mubr.msk.bf16.gmra.mrb[52].mxu1 %vm1127_vm0, %v1083_v58  ;;  %v1050_v4 = vmax.f32 %v970_v61, 0.0 }
 0x175   : > { %v965_v3 = vadd.f32 %v3744_v45, %v964_v2  ;;  %v1048_v6 = vmax.f32 %v962_v63, 0.0 }
 0x176   : > { %v1051_v5 = vmax.f32 %v973_v1, 0.0 }
 0x177   : > { %v1049_v7 = vmax.f32 %v965_v3, 0.0 }
 0x178   : > { %v1085_v8 = vpack.c.bf16 %v1051_v5, %v1050_v4 }
 0x179   : > { %v1084_v9 = vpack.c.bf16 %v1049_v7, %v1048_v6  ;;  %v3160_v10 = vpop.f32.mrb[60].mxu0 }
 0x17a   : > { %v986_v11 = vadd.f32 %v3160_v10, %v3744_v45  ;;  %v977_v12 = vpop.f32.mrb[61].mxu0 }
 0x17b   : > { %v978_v13 = vadd.f32 %v3744_v45, %v977_v12  ;;  %v3161_v14 = vpop.f32.mrb[62].mxu0  ;;  %3226 = vmatprep.mubr.msk.bf16.mxu1 %vm1127_vm0, %v1084_v9 }
 0x17c   : > { %v989_v15 = vadd.f32 %v3161_v14, %v3744_v45  ;;  %v980_v16 = vpop.f32.mrb[63].mxu0  ;;  %3227 = vmatmul.mubr.msk.bf16.gmra.mrb[56].mxu1 %vm1127_vm0, %v1085_v8  ;;  %v1054_v18 = vmax.f32 %v986_v11, 0.0 }
 0x17d   : > { %v981_v17 = vadd.f32 %v3744_v45, %v980_v16  ;;  %v1052_v20 = vmax.f32 %v978_v13, 0.0  ;;  %v3869_v45 = vld [vmem:[%s4309_s4] ss:$0 sm:$0xff] }
 0x17e   : > { %v1055_v19 = vmax.f32 %v989_v15, 0.0 }
 0x17f   : > { %v1053_v21 = vmax.f32 %v981_v17, 0.0 }
 0x180   : > { %v1087_v22 = vpack.c.bf16 %v1055_v19, %v1054_v18 }
 0x181   : > { %v1086_v23 = vpack.c.bf16 %v1053_v21, %v1052_v20 }
 0x183   : > { %3230 = vmatprep.mubr.msk.bf16.mxu1 %vm1127_vm0, %v1086_v23 }
 0x184   : > { %3231 = vmatmul.mubr.msk.bf16.gmra.mrb[60].mxu1 %vm1127_vm0, %v1087_v22 }
 0x1df   : > { %v3172_v25 = vpop.f32.mrb[0].mxu1 }
 0x1e0   : > { %v1267_v26 = vadd.f32 %v3172_v25, %v3869_v45  ;;  %v1258_v27 = vpop.f32.mrb[1].mxu1 }
 0x1e1   : > { %v1259_v28 = vadd.f32 %v3869_v45, %v1258_v27  ;;  %v3173_v29 = vpop.f32.mrb[2].mxu1 }
 0x1e2   : > { %v1515_v30 = vmax.f32 %v1267_v26, 0.0  ;;  %v1270_v31 = vadd.f32 %v3173_v29, %v3869_v45  ;;  %v1261_v32 = vpop.f32.mrb[3].mxu1 }
 0x1e3   : > { %v1513_v35 = vmax.f32 %v1259_v28, 0.0  ;;  %v1262_v36 = vadd.f32 %v3869_v45, %v1261_v32 }
 0x1e4   : > { %2555 = vst [vmem:[%s3876_s30 + $0x10] sm:$0xff] %v1515_v30  ;;  %v1516_v37 = vmax.f32 %v1270_v31, 0.0 }
 0x1e5   : > { %2553 = vst [vmem:[%s3876_s30] sm:$0xff] %v1513_v35  ;;  %v1514_v38 = vmax.f32 %v1262_v36, 0.0 }
 0x1e6   : > { %v1578_v39 = vpack.c.bf16 %v1516_v37, %v1515_v30  ;;  %2556 = vst [vmem:[%s3876_s30 + $0x18] sm:$0xff] %v1516_v37 }
 0x1e7   : > { %v1577_v41 = vpack.c.bf16 %v1514_v38, %v1513_v35  ;;  %2554 = vst [vmem:[%s3876_s30 + $0x8] sm:$0xff] %v1514_v38  ;;  %v3176_v42 = vpop.f32.mrb[4].mxu1 }
 0x1e8   : > { %v1283_v43 = vadd.f32 %v3176_v42, %v3869_v45  ;;  %v1274_v44 = vpop.f32.mrb[5].mxu1 }
 0x1e9   : > { %v1275_v46 = vadd.f32 %v3869_v45, %v1274_v44  ;;  %v3177_v47 = vpop.f32.mrb[6].mxu1  ;;  %3250 = vmatprep.mubr.bf16.mxu1 %v1577_v41 }
 0x1ea   : > { %v1519_v48 = vmax.f32 %v1283_v43, 0.0  ;;  %v1286_v49 = vadd.f32 %v3177_v47, %v3869_v45  ;;  %v1277_v50 = vpop.f32.mrb[7].mxu1  ;;  %3251 = vmatmul.mubr.bf16.vlgmr.msra.gmra.mrb[64].mxu1 %v1578_v39 }
 0x1eb   : > { %v1517_v51 = vmax.f32 %v1275_v46, 0.0  ;;  %v1278_v52 = vadd.f32 %v3869_v45, %v1277_v50  ;;  %3390 = vmatpush3.bf16.msra.mxu1 %v3487_v24 }
 0x1ec   : > { %2559 = vst [vmem:[%s3876_s30 + $0x30] sm:$0xff] %v1519_v48  ;;  %v1520_v53 = vmax.f32 %v1286_v49, 0.0  ;;  %3387 = vmatprep.subr.bf16.mxu1 %v3488_v33 }
 0x1ed   : > { %2557 = vst [vmem:[%s3876_s30 + $0x20] sm:$0xff] %v1517_v51  ;;  %v1518_v54 = vmax.f32 %v1278_v52, 0.0 }
 0x1ee   : > { %v1580_v55 = vpack.c.bf16 %v1520_v53, %v1519_v48  ;;  %2560 = vst [vmem:[%s3876_s30 + $0x38] sm:$0xff] %v1520_v53 }
 0x1ef   : > { %v1579_v56 = vpack.c.bf16 %v1518_v54, %v1517_v51  ;;  %2558 = vst [vmem:[%s3876_s30 + $0x28] sm:$0xff] %v1518_v54  ;;  %v3180_v57 = vpop.f32.mrb[8].mxu1  ;;  %3391 = vmatpush3.bf16.msra.mxu1 %v3488_v33 }
 0x1f0   : > { %v1299_v58 = vadd.f32 %v3180_v57, %v3869_v45  ;;  %v1290_v59 = vpop.f32.mrb[9].mxu1  ;;  %3388 = vmatprep.subr.bf16.mxu1 %v3489_v34 }
 0x1f1   : > { %v1291_v60 = vadd.f32 %v3869_v45, %v1290_v59  ;;  %v3181_v61 = vpop.f32.mrb[10].mxu1  ;;  %3254 = vmatprep.mubr.bf16.mxu1 %v1579_v56 }
 0x1f2   : > { %v1523_v62 = vmax.f32 %v1299_v58, 0.0  ;;  %v1302_v63 = vadd.f32 %v3181_v61, %v3869_v45  ;;  %v1293_v0 = vpop.f32.mrb[11].mxu1  ;;  %3255 = vmatmul.mubr.bf16.gmra.mrb[68].mxu1 %v1580_v55 }
 0x1f3   : > { %v1521_v1 = vmax.f32 %v1291_v60, 0.0  ;;  %v1294_v2 = vadd.f32 %v3869_v45, %v1293_v0  ;;  %3392 = vmatpush3.bf16.msra.mxu1 %v3489_v34 }
 0x1f4   : > { %2563 = vst [vmem:[%s3876_s30 + $0x50] sm:$0xff] %v1523_v62  ;;  %v1524_v3 = vmax.f32 %v1302_v63, 0.0  ;;  %3389 = vmatprep.subr.bf16.mxu1 %v3490_v40 }
 0x1f5   : > { %2561 = vst [vmem:[%s3876_s30 + $0x40] sm:$0xff] %v1521_v1  ;;  %v1522_v4 = vmax.f32 %v1294_v2, 0.0 }
 0x1f6   : > { %v1582_v5 = vpack.c.bf16 %v1524_v3, %v1523_v62  ;;  %2564 = vst [vmem:[%s3876_s30 + $0x58] sm:$0xff] %v1524_v3 }
 0x1f7   : > { %v1581_v6 = vpack.c.bf16 %v1522_v4, %v1521_v1  ;;  %2562 = vst [vmem:[%s3876_s30 + $0x48] sm:$0xff] %v1522_v4  ;;  %v3184_v7 = vpop.f32.mrb[12].mxu1  ;;  %3393 = vmatpush3.bf16.msra.mxu1 %v3490_v40 }
 0x1f8   : > { %v1315_v8 = vadd.f32 %v3184_v7, %v3869_v45  ;;  %v1306_v9 = vpop.f32.mrb[13].mxu1 }
 0x1f9   : > { %v1307_v10 = vadd.f32 %v3869_v45, %v1306_v9  ;;  %v3185_v11 = vpop.f32.mrb[14].mxu1  ;;  %3258 = vmatprep.mubr.bf16.mxu1 %v1581_v6 }
 0x1fa   : > { %v1527_v12 = vmax.f32 %v1315_v8, 0.0  ;;  %v1318_v13 = vadd.f32 %v3185_v11, %v3869_v45  ;;  %v1309_v14 = vpop.f32.mrb[15].mxu1  ;;  %3259 = vmatmul.mubr.bf16.gmra.mrb[72].mxu1 %v1582_v5 }
 0x1fb   : > { %v1525_v15 = vmax.f32 %v1307_v10, 0.0  ;;  %v1310_v16 = vadd.f32 %v3869_v45, %v1309_v14 }
 0x1fc   : > { %2567 = vst [vmem:[%s3876_s30 + $0x70] sm:$0xff] %v1527_v12  ;;  %v1528_v17 = vmax.f32 %v1318_v13, 0.0 }
 0x1fd   : > { %2565 = vst [vmem:[%s3876_s30 + $0x60] sm:$0xff] %v1525_v15  ;;  %v1526_v18 = vmax.f32 %v1310_v16, 0.0 }
 0x1fe   : > { %v1584_v19 = vpack.c.bf16 %v1528_v17, %v1527_v12  ;;  %2568 = vst [vmem:[%s3876_s30 + $0x78] sm:$0xff] %v1528_v17 }
 0x1ff   : > { %v1583_v20 = vpack.c.bf16 %v1526_v18, %v1525_v15  ;;  %2566 = vst [vmem:[%s3876_s30 + $0x68] sm:$0xff] %v1526_v18  ;;  %v3188_v21 = vpop.f32.mrb[16].mxu1 }
 0x200   : > { %v1331_v22 = vadd.f32 %v3188_v21, %v3869_v45  ;;  %v1322_v23 = vpop.f32.mrb[17].mxu1 }
 0x201   : > { %v1323_v24 = vadd.f32 %v3869_v45, %v1322_v23  ;;  %v3189_v25 = vpop.f32.mrb[18].mxu1  ;;  %3262 = vmatprep.mubr.bf16.mxu1 %v1583_v20 }
 0x202   : > { %v1531_v26 = vmax.f32 %v1331_v22, 0.0  ;;  %v1334_v27 = vadd.f32 %v3189_v25, %v3869_v45  ;;  %v1325_v28 = vpop.f32.mrb[19].mxu1  ;;  %3263 = vmatmul.mubr.bf16.gmra.mrb[76].mxu1 %v1584_v19 }
 0x203   : > { %v1529_v29 = vmax.f32 %v1323_v24, 0.0  ;;  %v1326_v30 = vadd.f32 %v3869_v45, %v1325_v28 }
 0x204   : > { %2571 = vst [vmem:[%s3876_s30 + $0x90] sm:$0xff] %v1531_v26  ;;  %v1532_v31 = vmax.f32 %v1334_v27, 0.0 }
 0x205   : > { %2569 = vst [vmem:[%s3876_s30 + $0x80] sm:$0xff] %v1529_v29  ;;  %v1530_v32 = vmax.f32 %v1326_v30, 0.0 }
 0x206   : > { %v1586_v33 = vpack.c.bf16 %v1532_v31, %v1531_v26  ;;  %2572 = vst [vmem:[%s3876_s30 + $0x98] sm:$0xff] %v1532_v31 }
 0x207   : > { %v1585_v34 = vpack.c.bf16 %v1530_v32, %v1529_v29  ;;  %2570 = vst [vmem:[%s3876_s30 + $0x88] sm:$0xff] %v1530_v32  ;;  %v3192_v35 = vpop.f32.mrb[20].mxu1 }
 0x208   : > { %v1347_v36 = vadd.f32 %v3192_v35, %v3869_v45  ;;  %v1338_v37 = vpop.f32.mrb[21].mxu1 }
 0x209   : > { %v1339_v38 = vadd.f32 %v3869_v45, %v1338_v37  ;;  %v3193_v39 = vpop.f32.mrb[22].mxu1  ;;  %3266 = vmatprep.mubr.bf16.mxu1 %v1585_v34 }
 0x20a   : > { %v1535_v40 = vmax.f32 %v1347_v36, 0.0  ;;  %v1350_v41 = vadd.f32 %v3193_v39, %v3869_v45  ;;  %v1341_v42 = vpop.f32.mrb[23].mxu1  ;;  %3267 = vmatmul.mubr.bf16.gmra.mrb[80].mxu1 %v1586_v33 }
 0x20b   : > { %v1533_v43 = vmax.f32 %v1339_v38, 0.0  ;;  %v1342_v44 = vadd.f32 %v3869_v45, %v1341_v42 }
 0x20c   : > { %2575 = vst [vmem:[%s3876_s30 + $0xb0] sm:$0xff] %v1535_v40  ;;  %v1536_v46 = vmax.f32 %v1350_v41, 0.0 }
 0x20d   : > { %2573 = vst [vmem:[%s3876_s30 + $0xa0] sm:$0xff] %v1533_v43  ;;  %v1534_v47 = vmax.f32 %v1342_v44, 0.0 }
 0x20e   : > { %v1588_v48 = vpack.c.bf16 %v1536_v46, %v1535_v40  ;;  %2576 = vst [vmem:[%s3876_s30 + $0xb8] sm:$0xff] %v1536_v46 }
 0x20f   : > { %v1587_v49 = vpack.c.bf16 %v1534_v47, %v1533_v43  ;;  %2574 = vst [vmem:[%s3876_s30 + $0xa8] sm:$0xff] %v1534_v47  ;;  %v3196_v50 = vpop.f32.mrb[24].mxu1 }
 0x210   : > { %v1363_v51 = vadd.f32 %v3196_v50, %v3869_v45  ;;  %v1354_v52 = vpop.f32.mrb[25].mxu1 }
 0x211   : > { %v1355_v53 = vadd.f32 %v3869_v45, %v1354_v52  ;;  %v3197_v54 = vpop.f32.mrb[26].mxu1  ;;  %3270 = vmatprep.mubr.bf16.mxu1 %v1587_v49 }
 0x212   : > { %v1539_v55 = vmax.f32 %v1363_v51, 0.0  ;;  %v1366_v56 = vadd.f32 %v3197_v54, %v3869_v45  ;;  %v1357_v57 = vpop.f32.mrb[27].mxu1  ;;  %3271 = vmatmul.mubr.bf16.gmra.mrb[84].mxu1 %v1588_v48 }
 0x213   : > { %v1537_v58 = vmax.f32 %v1355_v53, 0.0  ;;  %v1358_v59 = vadd.f32 %v3869_v45, %v1357_v57 }
 0x214   : > { %2579 = vst [vmem:[%s3876_s30 + $0xd0] sm:$0xff] %v1539_v55  ;;  %v1540_v60 = vmax.f32 %v1366_v56, 0.0 }
 0x215   : > { %2577 = vst [vmem:[%s3876_s30 + $0xc0] sm:$0xff] %v1537_v58  ;;  %v1538_v61 = vmax.f32 %v1358_v59, 0.0 }
 0x216   : > { %v1590_v62 = vpack.c.bf16 %v1540_v60, %v1539_v55  ;;  %2580 = vst [vmem:[%s3876_s30 + $0xd8] sm:$0xff] %v1540_v60 }
 0x217   : > { %v1589_v63 = vpack.c.bf16 %v1538_v61, %v1537_v58  ;;  %2578 = vst [vmem:[%s3876_s30 + $0xc8] sm:$0xff] %v1538_v61  ;;  %v3200_v0 = vpop.f32.mrb[28].mxu1 }
 0x218   : > { %v1379_v1 = vadd.f32 %v3200_v0, %v3869_v45  ;;  %v1370_v2 = vpop.f32.mrb[29].mxu1 }
 0x219   : > { %v1371_v3 = vadd.f32 %v3869_v45, %v1370_v2  ;;  %v3201_v4 = vpop.f32.mrb[30].mxu1  ;;  %3274 = vmatprep.mubr.bf16.mxu1 %v1589_v63 }
 0x21a   : > { %v1543_v5 = vmax.f32 %v1379_v1, 0.0  ;;  %v1382_v6 = vadd.f32 %v3201_v4, %v3869_v45  ;;  %v1373_v7 = vpop.f32.mrb[31].mxu1  ;;  %3275 = vmatmul.mubr.bf16.gmra.mrb[88].mxu1 %v1590_v62 }
 0x21b   : > { %v1541_v8 = vmax.f32 %v1371_v3, 0.0  ;;  %v1374_v9 = vadd.f32 %v3869_v45, %v1373_v7 }
 0x21c   : > { %2583 = vst [vmem:[%s3876_s30 + $0xf0] sm:$0xff] %v1543_v5  ;;  %v1544_v10 = vmax.f32 %v1382_v6, 0.0 }
 0x21d   : > { %2581 = vst [vmem:[%s3876_s30 + $0xe0] sm:$0xff] %v1541_v8  ;;  %v1542_v11 = vmax.f32 %v1374_v9, 0.0 }
 0x21e   : > { %v1592_v12 = vpack.c.bf16 %v1544_v10, %v1543_v5  ;;  %2584 = vst [vmem:[%s3876_s30 + $0xf8] sm:$0xff] %v1544_v10 }
 0x21f   : > { %v1591_v13 = vpack.c.bf16 %v1542_v11, %v1541_v8  ;;  %2582 = vst [vmem:[%s3876_s30 + $0xe8] sm:$0xff] %v1542_v11  ;;  %v3204_v14 = vpop.f32.mrb[32].mxu1 }
 0x220   : > { %v1395_v15 = vadd.f32 %v3204_v14, %v3869_v45  ;;  %v1386_v16 = vpop.f32.mrb[33].mxu1 }
 0x221   : > { %v1387_v17 = vadd.f32 %v3869_v45, %v1386_v16  ;;  %v3205_v18 = vpop.f32.mrb[34].mxu1  ;;  %3278 = vmatprep.mubr.bf16.mxu1 %v1591_v13 }
 0x222   : > { %v1547_v19 = vmax.f32 %v1395_v15, 0.0  ;;  %v1398_v20 = vadd.f32 %v3205_v18, %v3869_v45  ;;  %v1389_v21 = vpop.f32.mrb[35].mxu1  ;;  %3279 = vmatmul.mubr.bf16.gmra.mrb[92].mxu1 %v1592_v12 }
 0x223   : > { %v1545_v22 = vmax.f32 %v1387_v17, 0.0  ;;  %v1390_v23 = vadd.f32 %v3869_v45, %v1389_v21 }
 0x224   : > { %2587 = vst [vmem:[%s3876_s30 + $0x110] sm:$0xff] %v1547_v19  ;;  %v1548_v24 = vmax.f32 %v1398_v20, 0.0 }
 0x225   : > { %2585 = vst [vmem:[%s3876_s30 + $0x100] sm:$0xff] %v1545_v22  ;;  %v1546_v25 = vmax.f32 %v1390_v23, 0.0 }
 0x226   : > { %v1594_v26 = vpack.c.bf16 %v1548_v24, %v1547_v19  ;;  %2588 = vst [vmem:[%s3876_s30 + $0x118] sm:$0xff] %v1548_v24 }
 0x227   : > { %v1593_v27 = vpack.c.bf16 %v1546_v25, %v1545_v22  ;;  %2586 = vst [vmem:[%s3876_s30 + $0x108] sm:$0xff] %v1546_v25  ;;  %v3208_v28 = vpop.f32.mrb[36].mxu1 }
 0x228   : > { %v1411_v29 = vadd.f32 %v3208_v28, %v3869_v45  ;;  %v1402_v30 = vpop.f32.mrb[37].mxu1 }
 0x229   : > { %v1403_v31 = vadd.f32 %v3869_v45, %v1402_v30  ;;  %v3209_v32 = vpop.f32.mrb[38].mxu1  ;;  %3282 = vmatprep.mubr.bf16.mxu1 %v1593_v27 }
 0x22a   : > { %v1551_v33 = vmax.f32 %v1411_v29, 0.0  ;;  %v1414_v34 = vadd.f32 %v3209_v32, %v3869_v45  ;;  %v1405_v35 = vpop.f32.mrb[39].mxu1  ;;  %3283 = vmatmul.mubr.bf16.gmra.mrb[96].mxu1 %v1594_v26 }
 0x22b   : > { %v1549_v36 = vmax.f32 %v1403_v31, 0.0  ;;  %v1406_v37 = vadd.f32 %v3869_v45, %v1405_v35 }
 0x22c   : > { %2591 = vst [vmem:[%s3876_s30 + $0x130] sm:$0xff] %v1551_v33  ;;  %v1552_v38 = vmax.f32 %v1414_v34, 0.0 }
 0x22d   : > { %2589 = vst [vmem:[%s3876_s30 + $0x120] sm:$0xff] %v1549_v36  ;;  %v1550_v39 = vmax.f32 %v1406_v37, 0.0 }
 0x22e   : > { %v1596_v40 = vpack.c.bf16 %v1552_v38, %v1551_v33  ;;  %2592 = vst [vmem:[%s3876_s30 + $0x138] sm:$0xff] %v1552_v38 }
 0x22f   : > { %v1595_v41 = vpack.c.bf16 %v1550_v39, %v1549_v36  ;;  %2590 = vst [vmem:[%s3876_s30 + $0x128] sm:$0xff] %v1550_v39  ;;  %v3212_v42 = vpop.f32.mrb[40].mxu1 }
 0x230   : > { %v1427_v43 = vadd.f32 %v3212_v42, %v3869_v45  ;;  %v1418_v44 = vpop.f32.mrb[41].mxu1 }
 0x231   : > { %v1419_v46 = vadd.f32 %v3869_v45, %v1418_v44  ;;  %v3213_v47 = vpop.f32.mrb[42].mxu1  ;;  %3286 = vmatprep.mubr.bf16.mxu1 %v1595_v41 }
 0x232   : > { %v1555_v48 = vmax.f32 %v1427_v43, 0.0  ;;  %v1430_v49 = vadd.f32 %v3213_v47, %v3869_v45  ;;  %v1421_v50 = vpop.f32.mrb[43].mxu1  ;;  %3287 = vmatmul.mubr.bf16.gmra.mrb[100].mxu1 %v1596_v40 }
 0x233   : > { %v1553_v51 = vmax.f32 %v1419_v46, 0.0  ;;  %v1422_v52 = vadd.f32 %v3869_v45, %v1421_v50 }
 0x234   : > { %2595 = vst [vmem:[%s3876_s30 + $0x150] sm:$0xff] %v1555_v48  ;;  %v1556_v53 = vmax.f32 %v1430_v49, 0.0 }
 0x235   : > { %2593 = vst [vmem:[%s3876_s30 + $0x140] sm:$0xff] %v1553_v51  ;;  %v1554_v54 = vmax.f32 %v1422_v52, 0.0 }
 0x236   : > { %v1598_v55 = vpack.c.bf16 %v1556_v53, %v1555_v48  ;;  %2596 = vst [vmem:[%s3876_s30 + $0x158] sm:$0xff] %v1556_v53 }
 0x237   : > { %v1597_v56 = vpack.c.bf16 %v1554_v54, %v1553_v51  ;;  %2594 = vst [vmem:[%s3876_s30 + $0x148] sm:$0xff] %v1554_v54  ;;  %v3216_v57 = vpop.f32.mrb[44].mxu1 }
 0x238   : > { %v1443_v58 = vadd.f32 %v3216_v57, %v3869_v45  ;;  %v1434_v59 = vpop.f32.mrb[45].mxu1 }
 0x239   : > { %v1435_v60 = vadd.f32 %v3869_v45, %v1434_v59  ;;  %v3217_v61 = vpop.f32.mrb[46].mxu1  ;;  %3290 = vmatprep.mubr.bf16.mxu1 %v1597_v56 }
 0x23a   : > { %v1559_v62 = vmax.f32 %v1443_v58, 0.0  ;;  %v1446_v63 = vadd.f32 %v3217_v61, %v3869_v45  ;;  %v1437_v0 = vpop.f32.mrb[47].mxu1  ;;  %3291 = vmatmul.mubr.bf16.gmra.mrb[104].mxu1 %v1598_v55 }
 0x23b   : > { %v1557_v1 = vmax.f32 %v1435_v60, 0.0  ;;  %v1438_v2 = vadd.f32 %v3869_v45, %v1437_v0  ;;  %v4017_v0 = vld [vmem:[%s4311_s6] ss:$0 sm:$0xff] }
 0x23c   : > { %2599 = vst [vmem:[%s3876_s30 + $0x170] sm:$0xff] %v1559_v62  ;;  %v1560_v3 = vmax.f32 %v1446_v63, 0.0 }
 0x23d   : > { %2597 = vst [vmem:[%s3876_s30 + $0x160] sm:$0xff] %v1557_v1  ;;  %v1558_v4 = vmax.f32 %v1438_v2, 0.0 }
 0x23e   : > { %v1600_v5 = vpack.c.bf16 %v1560_v3, %v1559_v62  ;;  %2600 = vst [vmem:[%s3876_s30 + $0x178] sm:$0xff] %v1560_v3 }
 0x23f   : > { %v1599_v6 = vpack.c.bf16 %v1558_v4, %v1557_v1  ;;  %2598 = vst [vmem:[%s3876_s30 + $0x168] sm:$0xff] %v1558_v4  ;;  %v3220_v7 = vpop.f32.mrb[48].mxu1 }
 0x240   : > { %v1459_v8 = vadd.f32 %v3220_v7, %v3869_v45  ;;  %v1450_v9 = vpop.f32.mrb[49].mxu1 }
 0x241   : > { %v1451_v10 = vadd.f32 %v3869_v45, %v1450_v9  ;;  %v3221_v11 = vpop.f32.mrb[50].mxu1  ;;  %3294 = vmatprep.mubr.bf16.mxu1 %v1599_v6 }
 0x242   : > { %v1563_v12 = vmax.f32 %v1459_v8, 0.0  ;;  %v1462_v13 = vadd.f32 %v3221_v11, %v3869_v45  ;;  %v1453_v14 = vpop.f32.mrb[51].mxu1  ;;  %3295 = vmatmul.mubr.bf16.gmra.mrb[108].mxu1 %v1600_v5 }
 0x243   : > { %v1561_v15 = vmax.f32 %v1451_v10, 0.0  ;;  %v1454_v16 = vadd.f32 %v3869_v45, %v1453_v14 }
 0x244   : > { %2603 = vst [vmem:[%s3876_s30 + $0x190] sm:$0xff] %v1563_v12  ;;  %v1564_v17 = vmax.f32 %v1462_v13, 0.0 }
 0x245   : > { %2601 = vst [vmem:[%s3876_s30 + $0x180] sm:$0xff] %v1561_v15  ;;  %v1562_v18 = vmax.f32 %v1454_v16, 0.0 }
 0x246   : > { %v1602_v19 = vpack.c.bf16 %v1564_v17, %v1563_v12  ;;  %2604 = vst [vmem:[%s3876_s30 + $0x198] sm:$0xff] %v1564_v17 }
 0x247   : > { %v1601_v20 = vpack.c.bf16 %v1562_v18, %v1561_v15  ;;  %2602 = vst [vmem:[%s3876_s30 + $0x188] sm:$0xff] %v1562_v18  ;;  %v3224_v21 = vpop.f32.mrb[52].mxu1 }
 0x248   : > { %v1475_v22 = vadd.f32 %v3224_v21, %v3869_v45  ;;  %v1466_v23 = vpop.f32.mrb[53].mxu1 }
 0x249   : > { %v1467_v24 = vadd.f32 %v3869_v45, %v1466_v23  ;;  %v3225_v25 = vpop.f32.mrb[54].mxu1  ;;  %3298 = vmatprep.mubr.bf16.mxu1 %v1601_v20 }
 0x24a   : > { %v1567_v26 = vmax.f32 %v1475_v22, 0.0  ;;  %v1478_v27 = vadd.f32 %v3225_v25, %v3869_v45  ;;  %v1469_v28 = vpop.f32.mrb[55].mxu1  ;;  %3299 = vmatmul.mubr.bf16.gmra.mrb[112].mxu1 %v1602_v19 }
 0x24b   : > { %v1565_v29 = vmax.f32 %v1467_v24, 0.0  ;;  %v1470_v30 = vadd.f32 %v3869_v45, %v1469_v28 }
 0x24c   : > { %2607 = vst [vmem:[%s3876_s30 + $0x1b0] sm:$0xff] %v1567_v26  ;;  %v1568_v31 = vmax.f32 %v1478_v27, 0.0 }
 0x24d   : > { %2605 = vst [vmem:[%s3876_s30 + $0x1a0] sm:$0xff] %v1565_v29  ;;  %v1566_v32 = vmax.f32 %v1470_v30, 0.0 }
 0x24e   : > { %v1604_v33 = vpack.c.bf16 %v1568_v31, %v1567_v26  ;;  %2608 = vst [vmem:[%s3876_s30 + $0x1b8] sm:$0xff] %v1568_v31 }
 0x24f   : > { %v1603_v34 = vpack.c.bf16 %v1566_v32, %v1565_v29  ;;  %2606 = vst [vmem:[%s3876_s30 + $0x1a8] sm:$0xff] %v1566_v32  ;;  %v3228_v35 = vpop.f32.mrb[56].mxu1 }
 0x250   : > { %v1491_v36 = vadd.f32 %v3228_v35, %v3869_v45  ;;  %v1482_v37 = vpop.f32.mrb[57].mxu1 }
 0x251   : > { %v1483_v38 = vadd.f32 %v3869_v45, %v1482_v37  ;;  %v3229_v39 = vpop.f32.mrb[58].mxu1  ;;  %3302 = vmatprep.mubr.bf16.mxu1 %v1603_v34 }
 0x252   : > { %v1571_v40 = vmax.f32 %v1491_v36, 0.0  ;;  %v1494_v41 = vadd.f32 %v3229_v39, %v3869_v45  ;;  %v1485_v42 = vpop.f32.mrb[59].mxu1  ;;  %3303 = vmatmul.mubr.bf16.gmra.mrb[116].mxu1 %v1604_v33 }
 0x253   : > { %v1569_v43 = vmax.f32 %v1483_v38, 0.0  ;;  %v1486_v44 = vadd.f32 %v3869_v45, %v1485_v42 }
 0x254   : > { %2611 = vst [vmem:[%s3876_s30 + $0x1d0] sm:$0xff] %v1571_v40  ;;  %v1572_v46 = vmax.f32 %v1494_v41, 0.0 }
 0x255   : > { %2609 = vst [vmem:[%s3876_s30 + $0x1c0] sm:$0xff] %v1569_v43  ;;  %v1570_v47 = vmax.f32 %v1486_v44, 0.0 }
 0x256   : > { %v1606_v48 = vpack.c.bf16 %v1572_v46, %v1571_v40  ;;  %2612 = vst [vmem:[%s3876_s30 + $0x1d8] sm:$0xff] %v1572_v46 }
 0x257   : > { %v1605_v49 = vpack.c.bf16 %v1570_v47, %v1569_v43  ;;  %2610 = vst [vmem:[%s3876_s30 + $0x1c8] sm:$0xff] %v1570_v47  ;;  %v3232_v50 = vpop.f32.mrb[60].mxu1 }
 0x258   : > { %v1507_v51 = vadd.f32 %v3232_v50, %v3869_v45  ;;  %v1498_v52 = vpop.f32.mrb[61].mxu1 }
 0x259   : > { %v1499_v53 = vadd.f32 %v3869_v45, %v1498_v52  ;;  %v3233_v54 = vpop.f32.mrb[62].mxu1  ;;  %3306 = vmatprep.mubr.bf16.mxu1 %v1605_v49 }
 0x25a   : > { %v1575_v55 = vmax.f32 %v1507_v51, 0.0  ;;  %v1510_v56 = vadd.f32 %v3233_v54, %v3869_v45  ;;  %v1501_v57 = vpop.f32.mrb[63].mxu1  ;;  %3307 = vmatmul.mubr.bf16.gmra.mrb[120].mxu1 %v1606_v48 }
 0x25b   : > { %v1573_v58 = vmax.f32 %v1499_v53, 0.0  ;;  %v1502_v59 = vadd.f32 %v3869_v45, %v1501_v57 }
 0x25c   : > { %2615 = vst [vmem:[%s3876_s30 + $0x1f0] sm:$0xff] %v1575_v55  ;;  %v1576_v60 = vmax.f32 %v1510_v56, 0.0 }
 0x25d   : > { %2613 = vst [vmem:[%s3876_s30 + $0x1e0] sm:$0xff] %v1573_v58  ;;  %v1574_v61 = vmax.f32 %v1502_v59, 0.0 }
 0x25e   : > { %v1608_v62 = vpack.c.bf16 %v1576_v60, %v1575_v55  ;;  %2616 = vst [vmem:[%s3876_s30 + $0x1f8] sm:$0xff] %v1576_v60 }
 0x25f   : > { %v1607_v63 = vpack.c.bf16 %v1574_v61, %v1573_v58  ;;  %2614 = vst [vmem:[%s3876_s30 + $0x1e8] sm:$0xff] %v1574_v61  ;;  %s3495_s30 = sshll.u32 %s3555_s21, 4  ;;  %s3496_s30 = int_to_ptr.vmem [resolvable:$false] %s3495_s30 }
 0x260   : > { %s3497_s27 = scalar_lea.vmem %s3496_s30, 16384  ;;  %p3498_p0 = scmp.lt.s32.totalorder %s4257_s18, %s3496_s30 }
 0x261   : > { %3310 = vmatprep.mubr.bf16.mxu1 %v1607_v63  ;;  %p3499_p1 = scmp.lt.s32.totalorder %s3497_s27, %s3491_s28 }
 0x262   : > { %3311 = vmatmul.mubr.bf16.gmra.mrb[124].mxu1 %v1608_v62 }
 0x263   : > { %p3500_p2 = por %p3499_p1, %p3498_p0 }
 0x265   : > { %p3501_p3 = pnand %p3500_p2, %p3494_p13 }
 0x2bd   : > { %v3252_v1 = vpop.f32.mrb[64].mxu1 }
 0x2be   : > { %v1723_v2 = vadd.f32 %v3252_v1, %v4017_v0  ;;  %v1714_v3 = vpop.f32.mrb[65].mxu1 }
 0x2bf   : > { %v1715_v45 = vadd.f32 %v4017_v0, %v1714_v3  ;;  %v3253_v4 = vpop.f32.mrb[66].mxu1 }
 0x2c0   : > { %v1726_v5 = vadd.f32 %v3253_v4, %v4017_v0  ;;  %v1717_v6 = vpop.f32.mrb[67].mxu1  ;;  %v1971_v8 = vmax.f32 %v1723_v2, 0.0 }
 0x2c1   : > { %v1718_v7 = vadd.f32 %v4017_v0, %v1717_v6  ;;  %v1969_v10 = vmax.f32 %v1715_v45, 0.0 }
 0x2c2   : > { %v1972_v9 = vmax.f32 %v1726_v5, 0.0 }
 0x2c3   : > { %v1970_v11 = vmax.f32 %v1718_v7, 0.0 }
 0x2c4   : > { %v2034_v12 = vpack.c.bf16 %v1972_v9, %v1971_v8 }
 0x2c5   : > { %v2033_v13 = vpack.c.bf16 %v1970_v11, %v1969_v10  ;;  %v3256_v14 = vpop.f32.mrb[68].mxu1 }
 0x2c6   : > { %v1739_v15 = vadd.f32 %v3256_v14, %v4017_v0  ;;  %v1730_v16 = vpop.f32.mrb[69].mxu1 }
 0x2c7   : > { %v1731_v17 = vadd.f32 %v4017_v0, %v1730_v16  ;;  %v3257_v18 = vpop.f32.mrb[70].mxu1  ;;  %3322 = vmatprep.mubr.msk.bf16.mxu0 %vm1127_vm0, %v2033_v13 }
 0x2c8   : > { %v1742_v19 = vadd.f32 %v3257_v18, %v4017_v0  ;;  %v1733_v20 = vpop.f32.mrb[71].mxu1  ;;  %3323 = vmatmul.mubr.msk.bf16.vlgmr.msra.gmra.mrb[64].mxu0 %vm1127_vm0, %v2034_v12  ;;  %v1975_v22 = vmax.f32 %v1739_v15, 0.0 }
 0x2c9   : > { %v1734_v21 = vadd.f32 %v4017_v0, %v1733_v20  ;;  %v1973_v24 = vmax.f32 %v1731_v17, 0.0 }
 0x2ca   : > { %v1976_v23 = vmax.f32 %v1742_v19, 0.0 }
 0x2cb   : > { %v1974_v25 = vmax.f32 %v1734_v21, 0.0 }
 0x2cc   : > { %v2036_v26 = vpack.c.bf16 %v1976_v23, %v1975_v22 }
 0x2cd   : > { %v2035_v27 = vpack.c.bf16 %v1974_v25, %v1973_v24  ;;  %v3260_v28 = vpop.f32.mrb[72].mxu1 }
 0x2ce   : > { %v1755_v29 = vadd.f32 %v3260_v28, %v4017_v0  ;;  %v1746_v30 = vpop.f32.mrb[73].mxu1 }
 0x2cf   : > { %v1747_v31 = vadd.f32 %v4017_v0, %v1746_v30  ;;  %v3261_v32 = vpop.f32.mrb[74].mxu1  ;;  %3326 = vmatprep.mubr.msk.bf16.mxu0 %vm1127_vm0, %v2035_v27 }
 0x2d0   : > { %v1758_v33 = vadd.f32 %v3261_v32, %v4017_v0  ;;  %v1749_v34 = vpop.f32.mrb[75].mxu1  ;;  %3327 = vmatmul.mubr.msk.bf16.gmra.mrb[68].mxu0 %vm1127_vm0, %v2036_v26  ;;  %v1979_v36 = vmax.f32 %v1755_v29, 0.0 }
 0x2d1   : > { %v1750_v35 = vadd.f32 %v4017_v0, %v1749_v34  ;;  %v1977_v38 = vmax.f32 %v1747_v31, 0.0 }
 0x2d2   : > { %v1980_v37 = vmax.f32 %v1758_v33, 0.0 }
 0x2d3   : > { %v1978_v39 = vmax.f32 %v1750_v35, 0.0 }
 0x2d4   : > { %v2038_v40 = vpack.c.bf16 %v1980_v37, %v1979_v36 }
 0x2d5   : > { %v2037_v41 = vpack.c.bf16 %v1978_v39, %v1977_v38  ;;  %v3264_v42 = vpop.f32.mrb[76].mxu1 }
 0x2d6   : > { %v1771_v43 = vadd.f32 %v3264_v42, %v4017_v0  ;;  %v1762_v44 = vpop.f32.mrb[77].mxu1 }
 0x2d7   : > { %v1763_v46 = vadd.f32 %v4017_v0, %v1762_v44  ;;  %v3265_v47 = vpop.f32.mrb[78].mxu1  ;;  %3330 = vmatprep.mubr.msk.bf16.mxu0 %vm1127_vm0, %v2037_v41 }
 0x2d8   : > { %v1774_v48 = vadd.f32 %v3265_v47, %v4017_v0  ;;  %v1765_v49 = vpop.f32.mrb[79].mxu1  ;;  %3331 = vmatmul.mubr.msk.bf16.gmra.mrb[72].mxu0 %vm1127_vm0, %v2038_v40  ;;  %v1983_v51 = vmax.f32 %v1771_v43, 0.0 }
 0x2d9   : > { %v1766_v50 = vadd.f32 %v4017_v0, %v1765_v49  ;;  %v1981_v53 = vmax.f32 %v1763_v46, 0.0 }
 0x2da   : > { %v1984_v52 = vmax.f32 %v1774_v48, 0.0 }
 0x2db   : > { %v1982_v54 = vmax.f32 %v1766_v50, 0.0 }
 0x2dc   : > { %v2040_v55 = vpack.c.bf16 %v1984_v52, %v1983_v51 }
 0x2dd   : > { %v2039_v56 = vpack.c.bf16 %v1982_v54, %v1981_v53  ;;  %v3268_v57 = vpop.f32.mrb[80].mxu1 }
 0x2de   : > { %v1787_v58 = vadd.f32 %v3268_v57, %v4017_v0  ;;  %v1778_v59 = vpop.f32.mrb[81].mxu1 }
 0x2df   : > { %v1779_v60 = vadd.f32 %v4017_v0, %v1778_v59  ;;  %v3269_v61 = vpop.f32.mrb[82].mxu1  ;;  %3334 = vmatprep.mubr.msk.bf16.mxu0 %vm1127_vm0, %v2039_v56 }
 0x2e0   : > { %v1790_v62 = vadd.f32 %v3269_v61, %v4017_v0  ;;  %v1781_v63 = vpop.f32.mrb[83].mxu1  ;;  %3335 = vmatmul.mubr.msk.bf16.gmra.mrb[76].mxu0 %vm1127_vm0, %v2040_v55  ;;  %v1987_v2 = vmax.f32 %v1787_v58, 0.0 }
 0x2e1   : > { %v1782_v1 = vadd.f32 %v4017_v0, %v1781_v63  ;;  %v1985_v45 = vmax.f32 %v1779_v60, 0.0 }
 0x2e2   : > { %v1988_v3 = vmax.f32 %v1790_v62, 0.0 }
 0x2e3   : > { %v1986_v4 = vmax.f32 %v1782_v1, 0.0 }
 0x2e4   : > { %v2042_v5 = vpack.c.bf16 %v1988_v3, %v1987_v2 }
 0x2e5   : > { %v2041_v6 = vpack.c.bf16 %v1986_v4, %v1985_v45  ;;  %v3272_v7 = vpop.f32.mrb[84].mxu1 }
 0x2e6   : > { %v1803_v8 = vadd.f32 %v3272_v7, %v4017_v0  ;;  %v1794_v9 = vpop.f32.mrb[85].mxu1 }
 0x2e7   : > { %v1795_v10 = vadd.f32 %v4017_v0, %v1794_v9  ;;  %v3273_v11 = vpop.f32.mrb[86].mxu1  ;;  %3338 = vmatprep.mubr.msk.bf16.mxu0 %vm1127_vm0, %v2041_v6 }
 0x2e8   : > { %v1806_v12 = vadd.f32 %v3273_v11, %v4017_v0  ;;  %v1797_v13 = vpop.f32.mrb[87].mxu1  ;;  %3339 = vmatmul.mubr.msk.bf16.gmra.mrb[80].mxu0 %vm1127_vm0, %v2042_v5  ;;  %v1991_v15 = vmax.f32 %v1803_v8, 0.0 }
 0x2e9   : > { %v1798_v14 = vadd.f32 %v4017_v0, %v1797_v13  ;;  %v1989_v17 = vmax.f32 %v1795_v10, 0.0 }
 0x2ea   : > { %v1992_v16 = vmax.f32 %v1806_v12, 0.0 }
 0x2eb   : > { %v1990_v18 = vmax.f32 %v1798_v14, 0.0 }
 0x2ec   : > { %v2044_v19 = vpack.c.bf16 %v1992_v16, %v1991_v15 }
 0x2ed   : > { %v2043_v20 = vpack.c.bf16 %v1990_v18, %v1989_v17  ;;  %v3276_v21 = vpop.f32.mrb[88].mxu1 }
 0x2ee   : > { %v1819_v22 = vadd.f32 %v3276_v21, %v4017_v0  ;;  %v1810_v23 = vpop.f32.mrb[89].mxu1 }
 0x2ef   : > { %v1811_v24 = vadd.f32 %v4017_v0, %v1810_v23  ;;  %v3277_v25 = vpop.f32.mrb[90].mxu1  ;;  %3342 = vmatprep.mubr.msk.bf16.mxu0 %vm1127_vm0, %v2043_v20 }
 0x2f0   : > { %v1822_v26 = vadd.f32 %v3277_v25, %v4017_v0  ;;  %v1813_v27 = vpop.f32.mrb[91].mxu1  ;;  %3343 = vmatmul.mubr.msk.bf16.gmra.mrb[84].mxu0 %vm1127_vm0, %v2044_v19  ;;  %v1995_v29 = vmax.f32 %v1819_v22, 0.0 }
 0x2f1   : > { %v1814_v28 = vadd.f32 %v4017_v0, %v1813_v27  ;;  %v1993_v31 = vmax.f32 %v1811_v24, 0.0 }
 0x2f2   : > { %v1996_v30 = vmax.f32 %v1822_v26, 0.0 }
 0x2f3   : > { %v1994_v32 = vmax.f32 %v1814_v28, 0.0 }
 0x2f4   : > { %v2046_v33 = vpack.c.bf16 %v1996_v30, %v1995_v29 }
 0x2f5   : > { %v2045_v34 = vpack.c.bf16 %v1994_v32, %v1993_v31  ;;  %v3280_v35 = vpop.f32.mrb[92].mxu1 }
 0x2f6   : > { %v1835_v36 = vadd.f32 %v3280_v35, %v4017_v0  ;;  %v1826_v37 = vpop.f32.mrb[93].mxu1 }
 0x2f7   : > { %v1827_v38 = vadd.f32 %v4017_v0, %v1826_v37  ;;  %v3281_v39 = vpop.f32.mrb[94].mxu1  ;;  %3346 = vmatprep.mubr.msk.bf16.mxu0 %vm1127_vm0, %v2045_v34 }
 0x2f8   : > { %v1838_v40 = vadd.f32 %v3281_v39, %v4017_v0  ;;  %v1829_v41 = vpop.f32.mrb[95].mxu1  ;;  %3347 = vmatmul.mubr.msk.bf16.gmra.mrb[88].mxu0 %vm1127_vm0, %v2046_v33  ;;  %v1999_v43 = vmax.f32 %v1835_v36, 0.0 }
 0x2f9   : > { %v1830_v42 = vadd.f32 %v4017_v0, %v1829_v41  ;;  %v1997_v46 = vmax.f32 %v1827_v38, 0.0 }
 0x2fa   : > { %v2000_v44 = vmax.f32 %v1838_v40, 0.0 }
 0x2fb   : > { %v1998_v47 = vmax.f32 %v1830_v42, 0.0 }
 0x2fc   : > { %v2048_v48 = vpack.c.bf16 %v2000_v44, %v1999_v43 }
 0x2fd   : > { %v2047_v49 = vpack.c.bf16 %v1998_v47, %v1997_v46  ;;  %v3284_v50 = vpop.f32.mrb[96].mxu1 }
 0x2fe   : > { %v1851_v51 = vadd.f32 %v3284_v50, %v4017_v0  ;;  %v1842_v52 = vpop.f32.mrb[97].mxu1 }
 0x2ff   : > { %v1843_v53 = vadd.f32 %v4017_v0, %v1842_v52  ;;  %v3285_v54 = vpop.f32.mrb[98].mxu1  ;;  %3350 = vmatprep.mubr.msk.bf16.mxu0 %vm1127_vm0, %v2047_v49 }
 0x300   : > { %v1854_v55 = vadd.f32 %v3285_v54, %v4017_v0  ;;  %v1845_v56 = vpop.f32.mrb[99].mxu1  ;;  %3351 = vmatmul.mubr.msk.bf16.gmra.mrb[92].mxu0 %vm1127_vm0, %v2048_v48  ;;  %v2003_v58 = vmax.f32 %v1851_v51, 0.0 }
 0x301   : > { %v1846_v57 = vadd.f32 %v4017_v0, %v1845_v56  ;;  %v2001_v60 = vmax.f32 %v1843_v53, 0.0 }
 0x302   : > { %v2004_v59 = vmax.f32 %v1854_v55, 0.0 }
 0x303   : > { %v2002_v61 = vmax.f32 %v1846_v57, 0.0 }
 0x304   : > { %v2050_v62 = vpack.c.bf16 %v2004_v59, %v2003_v58 }
 0x305   : > { %v2049_v63 = vpack.c.bf16 %v2002_v61, %v2001_v60  ;;  %v3288_v1 = vpop.f32.mrb[100].mxu1 }
 0x306   : > { %v1867_v2 = vadd.f32 %v3288_v1, %v4017_v0  ;;  %v1858_v3 = vpop.f32.mrb[101].mxu1 }
 0x307   : > { %v1859_v45 = vadd.f32 %v4017_v0, %v1858_v3  ;;  %v3289_v4 = vpop.f32.mrb[102].mxu1  ;;  %3354 = vmatprep.mubr.msk.bf16.mxu0 %vm1127_vm0, %v2049_v63 }
 0x308   : > { %v1870_v5 = vadd.f32 %v3289_v4, %v4017_v0  ;;  %v1861_v6 = vpop.f32.mrb[103].mxu1  ;;  %3355 = vmatmul.mubr.msk.bf16.gmra.mrb[96].mxu0 %vm1127_vm0, %v2050_v62  ;;  %v2007_v8 = vmax.f32 %v1867_v2, 0.0 }
 0x309   : > { %v1862_v7 = vadd.f32 %v4017_v0, %v1861_v6  ;;  %v2005_v10 = vmax.f32 %v1859_v45, 0.0 }
 0x30a   : > { %v2008_v9 = vmax.f32 %v1870_v5, 0.0 }
 0x30b   : > { %v2006_v11 = vmax.f32 %v1862_v7, 0.0 }
 0x30c   : > { %v2052_v12 = vpack.c.bf16 %v2008_v9, %v2007_v8 }
 0x30d   : > { %v2051_v13 = vpack.c.bf16 %v2006_v11, %v2005_v10  ;;  %v3292_v14 = vpop.f32.mrb[104].mxu1 }
 0x30e   : > { %v1883_v15 = vadd.f32 %v3292_v14, %v4017_v0  ;;  %v1874_v16 = vpop.f32.mrb[105].mxu1 }
 0x30f   : > { %v1875_v17 = vadd.f32 %v4017_v0, %v1874_v16  ;;  %v3293_v18 = vpop.f32.mrb[106].mxu1  ;;  %3358 = vmatprep.mubr.msk.bf16.mxu0 %vm1127_vm0, %v2051_v13 }
 0x310   : > { %v1886_v19 = vadd.f32 %v3293_v18, %v4017_v0  ;;  %v1877_v20 = vpop.f32.mrb[107].mxu1  ;;  %3359 = vmatmul.mubr.msk.bf16.gmra.mrb[100].mxu0 %vm1127_vm0, %v2052_v12  ;;  %v2011_v22 = vmax.f32 %v1883_v15, 0.0 }
 0x311   : > { %v1878_v21 = vadd.f32 %v4017_v0, %v1877_v20  ;;  %v2009_v24 = vmax.f32 %v1875_v17, 0.0 }
 0x312   : > { %v2012_v23 = vmax.f32 %v1886_v19, 0.0 }
 0x313   : > { %v2010_v25 = vmax.f32 %v1878_v21, 0.0 }
 0x314   : > { %v2054_v26 = vpack.c.bf16 %v2012_v23, %v2011_v22 }
 0x315   : > { %v2053_v27 = vpack.c.bf16 %v2010_v25, %v2009_v24  ;;  %v3296_v28 = vpop.f32.mrb[108].mxu1 }
 0x316   : > { %v1899_v29 = vadd.f32 %v3296_v28, %v4017_v0  ;;  %v1890_v30 = vpop.f32.mrb[109].mxu1 }
 0x317   : > { %v1891_v31 = vadd.f32 %v4017_v0, %v1890_v30  ;;  %v3297_v32 = vpop.f32.mrb[110].mxu1  ;;  %3362 = vmatprep.mubr.msk.bf16.mxu0 %vm1127_vm0, %v2053_v27 }
 0x318   : > { %v1902_v33 = vadd.f32 %v3297_v32, %v4017_v0  ;;  %v1893_v34 = vpop.f32.mrb[111].mxu1  ;;  %3363 = vmatmul.mubr.msk.bf16.gmra.mrb[104].mxu0 %vm1127_vm0, %v2054_v26  ;;  %v2015_v36 = vmax.f32 %v1899_v29, 0.0 }
 0x319   : > { %v1894_v35 = vadd.f32 %v4017_v0, %v1893_v34  ;;  %v2013_v38 = vmax.f32 %v1891_v31, 0.0 }
 0x31a   : > { %v2016_v37 = vmax.f32 %v1902_v33, 0.0 }
 0x31b   : > { %v2014_v39 = vmax.f32 %v1894_v35, 0.0  ;;  %v4119_v35 = vld [vmem:[%s4313_s8] ss:$0 sm:$0xff] }
 0x31c   : > { %v2056_v40 = vpack.c.bf16 %v2016_v37, %v2015_v36 }
 0x31d   : > { %v2055_v41 = vpack.c.bf16 %v2014_v39, %v2013_v38  ;;  %v3300_v42 = vpop.f32.mrb[112].mxu1 }
 0x31e   : > { %v1915_v43 = vadd.f32 %v3300_v42, %v4017_v0  ;;  %v1906_v44 = vpop.f32.mrb[113].mxu1 }
 0x31f   : > { %v1907_v46 = vadd.f32 %v4017_v0, %v1906_v44  ;;  %v3301_v47 = vpop.f32.mrb[114].mxu1  ;;  %3366 = vmatprep.mubr.msk.bf16.mxu0 %vm1127_vm0, %v2055_v41 }
 0x320   : > { %v1918_v48 = vadd.f32 %v3301_v47, %v4017_v0  ;;  %v1909_v49 = vpop.f32.mrb[115].mxu1  ;;  %3367 = vmatmul.mubr.msk.bf16.gmra.mrb[108].mxu0 %vm1127_vm0, %v2056_v40  ;;  %v2019_v51 = vmax.f32 %v1915_v43, 0.0 }
 0x321   : > { %v1910_v50 = vadd.f32 %v4017_v0, %v1909_v49  ;;  %v2017_v53 = vmax.f32 %v1907_v46, 0.0 }
 0x322   : > { %v2020_v52 = vmax.f32 %v1918_v48, 0.0 }
 0x323   : > { %v2018_v54 = vmax.f32 %v1910_v50, 0.0 }
 0x324   : > { %v2058_v55 = vpack.c.bf16 %v2020_v52, %v2019_v51 }
 0x325   : > { %v2057_v56 = vpack.c.bf16 %v2018_v54, %v2017_v53  ;;  %v3304_v57 = vpop.f32.mrb[116].mxu1 }
 0x326   : > { %v1931_v58 = vadd.f32 %v3304_v57, %v4017_v0  ;;  %v1922_v59 = vpop.f32.mrb[117].mxu1 }
 0x327   : > { %v1923_v60 = vadd.f32 %v4017_v0, %v1922_v59  ;;  %v3305_v61 = vpop.f32.mrb[118].mxu1  ;;  %3370 = vmatprep.mubr.msk.bf16.mxu0 %vm1127_vm0, %v2057_v56 }
 0x328   : > { %v1934_v62 = vadd.f32 %v3305_v61, %v4017_v0  ;;  %v1925_v63 = vpop.f32.mrb[119].mxu1  ;;  %3371 = vmatmul.mubr.msk.bf16.gmra.mrb[112].mxu0 %vm1127_vm0, %v2058_v55  ;;  %v2023_v2 = vmax.f32 %v1931_v58, 0.0 }
 0x329   : > { %v1926_v1 = vadd.f32 %v4017_v0, %v1925_v63  ;;  %v2021_v45 = vmax.f32 %v1923_v60, 0.0 }
 0x32a   : > { %v2024_v3 = vmax.f32 %v1934_v62, 0.0 }
 0x32b   : > { %v2022_v4 = vmax.f32 %v1926_v1, 0.0 }
 0x32c   : > { %v2060_v5 = vpack.c.bf16 %v2024_v3, %v2023_v2 }
 0x32d   : > { %v2059_v6 = vpack.c.bf16 %v2022_v4, %v2021_v45  ;;  %v3308_v7 = vpop.f32.mrb[120].mxu1 }
 0x32e   : > { %v1947_v8 = vadd.f32 %v3308_v7, %v4017_v0  ;;  %v1938_v9 = vpop.f32.mrb[121].mxu1 }
 0x32f   : > { %v1939_v10 = vadd.f32 %v4017_v0, %v1938_v9  ;;  %v3309_v11 = vpop.f32.mrb[122].mxu1  ;;  %3374 = vmatprep.mubr.msk.bf16.mxu0 %vm1127_vm0, %v2059_v6 }
 0x330   : > { %v1950_v12 = vadd.f32 %v3309_v11, %v4017_v0  ;;  %v1941_v13 = vpop.f32.mrb[123].mxu1  ;;  %3375 = vmatmul.mubr.msk.bf16.gmra.mrb[116].mxu0 %vm1127_vm0, %v2060_v5  ;;  %v2027_v15 = vmax.f32 %v1947_v8, 0.0 }
 0x331   : > { %v1942_v14 = vadd.f32 %v4017_v0, %v1941_v13  ;;  %v2025_v17 = vmax.f32 %v1939_v10, 0.0 }
 0x332   : > { %v2028_v16 = vmax.f32 %v1950_v12, 0.0 }
 0x333   : > { %v2026_v18 = vmax.f32 %v1942_v14, 0.0 }
 0x334   : > { %v2062_v19 = vpack.c.bf16 %v2028_v16, %v2027_v15 }
 0x335   : > { %v2061_v20 = vpack.c.bf16 %v2026_v18, %v2025_v17  ;;  %v3312_v21 = vpop.f32.mrb[124].mxu1 }
 0x336   : > { %v1963_v22 = vadd.f32 %v3312_v21, %v4017_v0  ;;  %v1954_v23 = vpop.f32.mrb[125].mxu1 }
 0x337   : > { %v1955_v24 = vadd.f32 %v4017_v0, %v1954_v23  ;;  %v3313_v25 = vpop.f32.mrb[126].mxu1  ;;  %3378 = vmatprep.mubr.msk.bf16.mxu0 %vm1127_vm0, %v2061_v20 }
 0x338   : > { %v1966_v26 = vadd.f32 %v3313_v25, %v4017_v0  ;;  %v1957_v27 = vpop.f32.mrb[127].mxu1  ;;  %3379 = vmatmul.mubr.msk.bf16.gmra.mrb[120].mxu0 %vm1127_vm0, %v2062_v19  ;;  %v2031_v29 = vmax.f32 %v1963_v22, 0.0 }
 0x339   : > { %v1958_v28 = vadd.f32 %v4017_v0, %v1957_v27  ;;  %v2029_v31 = vmax.f32 %v1955_v24, 0.0 }
 0x33a   : > { %v2032_v30 = vmax.f32 %v1966_v26, 0.0 }
 0x33b   : > { %v2030_v32 = vmax.f32 %v1958_v28, 0.0 }
 0x33c   : > { %v2064_v33 = vpack.c.bf16 %v2032_v30, %v2031_v29 }
 0x33d   : > { %v2063_v34 = vpack.c.bf16 %v2030_v32, %v2029_v31 }
 0x33f   : > { %3382 = vmatprep.mubr.msk.bf16.mxu1 %vm1127_vm0, %v2063_v34 }
 0x340   : > { %3383 = vmatmul.mubr.msk.bf16.vlgmr.msra.gmra.mrb[128].mxu1 %vm1127_vm0, %v2064_v33 }
 0x39b   : > { %v3324_v36 = vpop.f32.mrb[64].mxu0 }
 0x39c   : > { %v2243_v0 = vadd.f32 %v3324_v36, %v4119_v35  ;;  %v2234_v37 = vpop.f32.mrb[65].mxu0 }
 0x39d   : > { %v2235_v38 = vadd.f32 %v4119_v35, %v2234_v37  ;;  %v3325_v39 = vpop.f32.mrb[66].mxu0 }
 0x39e   : > { %v2491_v40 = vmax.f32 %v2243_v0, 0.0  ;;  %v2246_v41 = vadd.f32 %v3325_v39, %v4119_v35  ;;  %v2237_v42 = vpop.f32.mrb[67].mxu0 }
 0x39f   : > { %v2489_v43 = vmax.f32 %v2235_v38, 0.0  ;;  %v2238_v44 = vadd.f32 %v4119_v35, %v2237_v42 }
 0x3a0   : > { %2619 = vst [vmem:[%s4127_s11 + $0x10] sm:$0xff] %v2491_v40  ;;  %v2492_v46 = vmax.f32 %v2246_v41, 0.0 }
 0x3a1   : > { %2617 = vst [vmem:[%s4127_s11] sm:$0xff] %v2489_v43  ;;  %v2490_v47 = vmax.f32 %v2238_v44, 0.0 }
 0x3a2   : > { %2620 = vst [vmem:[%s4127_s11 + $0x18] sm:$0xff] %v2492_v46 }
 0x3a3   : > { %2618 = vst [vmem:[%s4127_s11 + $0x8] sm:$0xff] %v2490_v47  ;;  %v3328_v48 = vpop.f32.mrb[68].mxu0 }
 0x3a4   : > { %v2259_v49 = vadd.f32 %v3328_v48, %v4119_v35  ;;  %v2250_v50 = vpop.f32.mrb[69].mxu0 }
 0x3a5   : > { %v2251_v51 = vadd.f32 %v4119_v35, %v2250_v50  ;;  %v3329_v52 = vpop.f32.mrb[70].mxu0 }
 0x3a6   : > { %v2495_v53 = vmax.f32 %v2259_v49, 0.0  ;;  %v2262_v54 = vadd.f32 %v3329_v52, %v4119_v35  ;;  %v2253_v55 = vpop.f32.mrb[71].mxu0 }
 0x3a7   : > { %v2493_v56 = vmax.f32 %v2251_v51, 0.0  ;;  %v2254_v57 = vadd.f32 %v4119_v35, %v2253_v55 }
 0x3a8   : > { %2623 = vst [vmem:[%s4127_s11 + $0x30] sm:$0xff] %v2495_v53  ;;  %v2496_v58 = vmax.f32 %v2262_v54, 0.0 }
 0x3a9   : > { %2621 = vst [vmem:[%s4127_s11 + $0x20] sm:$0xff] %v2493_v56  ;;  %v2494_v59 = vmax.f32 %v2254_v57, 0.0 }
 0x3aa   : > { %2624 = vst [vmem:[%s4127_s11 + $0x38] sm:$0xff] %v2496_v58 }
 0x3ab   : > { %2622 = vst [vmem:[%s4127_s11 + $0x28] sm:$0xff] %v2494_v59  ;;  %v3332_v60 = vpop.f32.mrb[72].mxu0 }
 0x3ac   : > { %v2275_v61 = vadd.f32 %v3332_v60, %v4119_v35  ;;  %v2266_v62 = vpop.f32.mrb[73].mxu0 }
 0x3ad   : > { %v2267_v63 = vadd.f32 %v4119_v35, %v2266_v62  ;;  %v3333_v1 = vpop.f32.mrb[74].mxu0 }
 0x3ae   : > { %v2499_v2 = vmax.f32 %v2275_v61, 0.0  ;;  %v2278_v3 = vadd.f32 %v3333_v1, %v4119_v35  ;;  %v2269_v45 = vpop.f32.mrb[75].mxu0 }
 0x3af   : > { %v2497_v4 = vmax.f32 %v2267_v63, 0.0  ;;  %v2270_v5 = vadd.f32 %v4119_v35, %v2269_v45 }
 0x3b0   : > { %2627 = vst [vmem:[%s4127_s11 + $0x50] sm:$0xff] %v2499_v2  ;;  %v2500_v6 = vmax.f32 %v2278_v3, 0.0 }
 0x3b1   : > { %2625 = vst [vmem:[%s4127_s11 + $0x40] sm:$0xff] %v2497_v4  ;;  %v2498_v7 = vmax.f32 %v2270_v5, 0.0 }
 0x3b2   : > { %2628 = vst [vmem:[%s4127_s11 + $0x58] sm:$0xff] %v2500_v6 }
 0x3b3   : > { %2626 = vst [vmem:[%s4127_s11 + $0x48] sm:$0xff] %v2498_v7  ;;  %v3336_v8 = vpop.f32.mrb[76].mxu0 }
 0x3b4   : > { %v2291_v9 = vadd.f32 %v3336_v8, %v4119_v35  ;;  %v2282_v10 = vpop.f32.mrb[77].mxu0 }
 0x3b5   : > { %v2283_v11 = vadd.f32 %v4119_v35, %v2282_v10  ;;  %v3337_v12 = vpop.f32.mrb[78].mxu0 }
 0x3b6   : > { %v2503_v13 = vmax.f32 %v2291_v9, 0.0  ;;  %v2294_v14 = vadd.f32 %v3337_v12, %v4119_v35  ;;  %v2285_v15 = vpop.f32.mrb[79].mxu0 }
 0x3b7   : > { %v2501_v16 = vmax.f32 %v2283_v11, 0.0  ;;  %v2286_v17 = vadd.f32 %v4119_v35, %v2285_v15 }
 0x3b8   : > { %2631 = vst [vmem:[%s4127_s11 + $0x70] sm:$0xff] %v2503_v13  ;;  %v2504_v18 = vmax.f32 %v2294_v14, 0.0 }
 0x3b9   : > { %2629 = vst [vmem:[%s4127_s11 + $0x60] sm:$0xff] %v2501_v16  ;;  %v2502_v19 = vmax.f32 %v2286_v17, 0.0 }
 0x3ba   : > { %2632 = vst [vmem:[%s4127_s11 + $0x78] sm:$0xff] %v2504_v18 }
 0x3bb   : > { %2630 = vst [vmem:[%s4127_s11 + $0x68] sm:$0xff] %v2502_v19  ;;  %v3340_v20 = vpop.f32.mrb[80].mxu0 }
 0x3bc   : > { %v2307_v21 = vadd.f32 %v3340_v20, %v4119_v35  ;;  %v2298_v22 = vpop.f32.mrb[81].mxu0 }
 0x3bd   : > { %v2299_v23 = vadd.f32 %v4119_v35, %v2298_v22  ;;  %v3341_v24 = vpop.f32.mrb[82].mxu0 }
 0x3be   : > { %v2507_v25 = vmax.f32 %v2307_v21, 0.0  ;;  %v2310_v26 = vadd.f32 %v3341_v24, %v4119_v35  ;;  %v2301_v27 = vpop.f32.mrb[83].mxu0 }
 0x3bf   : > { %v2505_v28 = vmax.f32 %v2299_v23, 0.0  ;;  %v2302_v29 = vadd.f32 %v4119_v35, %v2301_v27 }
 0x3c0   : > { %2635 = vst [vmem:[%s4127_s11 + $0x90] sm:$0xff] %v2507_v25  ;;  %v2508_v30 = vmax.f32 %v2310_v26, 0.0 }
 0x3c1   : > { %2633 = vst [vmem:[%s4127_s11 + $0x80] sm:$0xff] %v2505_v28  ;;  %v2506_v31 = vmax.f32 %v2302_v29, 0.0 }
 0x3c2   : > { %2636 = vst [vmem:[%s4127_s11 + $0x98] sm:$0xff] %v2508_v30 }
 0x3c3   : > { %2634 = vst [vmem:[%s4127_s11 + $0x88] sm:$0xff] %v2506_v31  ;;  %v3344_v32 = vpop.f32.mrb[84].mxu0 }
 0x3c4   : > { %v2323_v33 = vadd.f32 %v3344_v32, %v4119_v35  ;;  %v2314_v34 = vpop.f32.mrb[85].mxu0 }
 0x3c5   : > { %v2315_v36 = vadd.f32 %v4119_v35, %v2314_v34  ;;  %v3345_v0 = vpop.f32.mrb[86].mxu0 }
 0x3c6   : > { %v2511_v37 = vmax.f32 %v2323_v33, 0.0  ;;  %v2326_v38 = vadd.f32 %v3345_v0, %v4119_v35  ;;  %v2317_v39 = vpop.f32.mrb[87].mxu0 }
 0x3c7   : > { %v2509_v40 = vmax.f32 %v2315_v36, 0.0  ;;  %v2318_v41 = vadd.f32 %v4119_v35, %v2317_v39 }
 0x3c8   : > { %2639 = vst [vmem:[%s4127_s11 + $0xb0] sm:$0xff] %v2511_v37  ;;  %v2512_v42 = vmax.f32 %v2326_v38, 0.0 }
 0x3c9   : > { %2637 = vst [vmem:[%s4127_s11 + $0xa0] sm:$0xff] %v2509_v40  ;;  %v2510_v43 = vmax.f32 %v2318_v41, 0.0 }
 0x3ca   : > { %2640 = vst [vmem:[%s4127_s11 + $0xb8] sm:$0xff] %v2512_v42 }
 0x3cb   : > { %2638 = vst [vmem:[%s4127_s11 + $0xa8] sm:$0xff] %v2510_v43  ;;  %v3348_v44 = vpop.f32.mrb[88].mxu0 }
 0x3cc   : > { %v2339_v46 = vadd.f32 %v3348_v44, %v4119_v35  ;;  %v2330_v47 = vpop.f32.mrb[89].mxu0 }
 0x3cd   : > { %v2331_v48 = vadd.f32 %v4119_v35, %v2330_v47  ;;  %v3349_v49 = vpop.f32.mrb[90].mxu0 }
 0x3ce   : > { %v2515_v50 = vmax.f32 %v2339_v46, 0.0  ;;  %v2342_v51 = vadd.f32 %v3349_v49, %v4119_v35  ;;  %v2333_v52 = vpop.f32.mrb[91].mxu0 }
 0x3cf   : > { %v2513_v53 = vmax.f32 %v2331_v48, 0.0  ;;  %v2334_v54 = vadd.f32 %v4119_v35, %v2333_v52 }
 0x3d0   : > { %2643 = vst [vmem:[%s4127_s11 + $0xd0] sm:$0xff] %v2515_v50  ;;  %v2516_v55 = vmax.f32 %v2342_v51, 0.0 }
 0x3d1   : > { %2641 = vst [vmem:[%s4127_s11 + $0xc0] sm:$0xff] %v2513_v53  ;;  %v2514_v56 = vmax.f32 %v2334_v54, 0.0 }
 0x3d2   : > { %2644 = vst [vmem:[%s4127_s11 + $0xd8] sm:$0xff] %v2516_v55 }
 0x3d3   : > { %2642 = vst [vmem:[%s4127_s11 + $0xc8] sm:$0xff] %v2514_v56  ;;  %v3352_v57 = vpop.f32.mrb[92].mxu0 }
 0x3d4   : > { %v2355_v58 = vadd.f32 %v3352_v57, %v4119_v35  ;;  %v2346_v59 = vpop.f32.mrb[93].mxu0 }
 0x3d5   : > { %v2347_v60 = vadd.f32 %v4119_v35, %v2346_v59  ;;  %v3353_v61 = vpop.f32.mrb[94].mxu0 }
 0x3d6   : > { %v2519_v62 = vmax.f32 %v2355_v58, 0.0  ;;  %v2358_v63 = vadd.f32 %v3353_v61, %v4119_v35  ;;  %v2349_v1 = vpop.f32.mrb[95].mxu0 }
 0x3d7   : > { %v2517_v2 = vmax.f32 %v2347_v60, 0.0  ;;  %v2350_v3 = vadd.f32 %v4119_v35, %v2349_v1 }
 0x3d8   : > { %2647 = vst [vmem:[%s4127_s11 + $0xf0] sm:$0xff] %v2519_v62  ;;  %v2520_v45 = vmax.f32 %v2358_v63, 0.0 }
 0x3d9   : > { %2645 = vst [vmem:[%s4127_s11 + $0xe0] sm:$0xff] %v2517_v2  ;;  %v2518_v4 = vmax.f32 %v2350_v3, 0.0 }
 0x3da   : > { %2648 = vst [vmem:[%s4127_s11 + $0xf8] sm:$0xff] %v2520_v45 }
 0x3db   : > { %2646 = vst [vmem:[%s4127_s11 + $0xe8] sm:$0xff] %v2518_v4  ;;  %v3356_v5 = vpop.f32.mrb[96].mxu0 }
 0x3dc   : > { %v2371_v6 = vadd.f32 %v3356_v5, %v4119_v35  ;;  %v2362_v7 = vpop.f32.mrb[97].mxu0 }
 0x3dd   : > { %v2363_v8 = vadd.f32 %v4119_v35, %v2362_v7  ;;  %v3357_v9 = vpop.f32.mrb[98].mxu0 }
 0x3de   : > { %v2523_v10 = vmax.f32 %v2371_v6, 0.0  ;;  %v2374_v11 = vadd.f32 %v3357_v9, %v4119_v35  ;;  %v2365_v12 = vpop.f32.mrb[99].mxu0 }
 0x3df   : > { %v2521_v13 = vmax.f32 %v2363_v8, 0.0  ;;  %v2366_v14 = vadd.f32 %v4119_v35, %v2365_v12 }
 0x3e0   : > { %2651 = vst [vmem:[%s4127_s11 + $0x110] sm:$0xff] %v2523_v10  ;;  %v2524_v15 = vmax.f32 %v2374_v11, 0.0 }
 0x3e1   : > { %2649 = vst [vmem:[%s4127_s11 + $0x100] sm:$0xff] %v2521_v13  ;;  %v2522_v16 = vmax.f32 %v2366_v14, 0.0 }
 0x3e2   : > { %2652 = vst [vmem:[%s4127_s11 + $0x118] sm:$0xff] %v2524_v15 }
 0x3e3   : > { %2650 = vst [vmem:[%s4127_s11 + $0x108] sm:$0xff] %v2522_v16  ;;  %v3360_v17 = vpop.f32.mrb[100].mxu0 }
 0x3e4   : > { %v2387_v18 = vadd.f32 %v3360_v17, %v4119_v35  ;;  %v2378_v19 = vpop.f32.mrb[101].mxu0 }
 0x3e5   : > { %v2379_v20 = vadd.f32 %v4119_v35, %v2378_v19  ;;  %v3361_v21 = vpop.f32.mrb[102].mxu0 }
 0x3e6   : > { %v2527_v22 = vmax.f32 %v2387_v18, 0.0  ;;  %v2390_v23 = vadd.f32 %v3361_v21, %v4119_v35  ;;  %v2381_v24 = vpop.f32.mrb[103].mxu0 }
 0x3e7   : > { %v2525_v25 = vmax.f32 %v2379_v20, 0.0  ;;  %v2382_v26 = vadd.f32 %v4119_v35, %v2381_v24 }
 0x3e8   : > { %2655 = vst [vmem:[%s4127_s11 + $0x130] sm:$0xff] %v2527_v22  ;;  %v2528_v27 = vmax.f32 %v2390_v23, 0.0 }
 0x3e9   : > { %2653 = vst [vmem:[%s4127_s11 + $0x120] sm:$0xff] %v2525_v25  ;;  %v2526_v28 = vmax.f32 %v2382_v26, 0.0 }
 0x3ea   : > { %2656 = vst [vmem:[%s4127_s11 + $0x138] sm:$0xff] %v2528_v27 }
 0x3eb   : > { %2654 = vst [vmem:[%s4127_s11 + $0x128] sm:$0xff] %v2526_v28  ;;  %v3364_v29 = vpop.f32.mrb[104].mxu0 }
 0x3ec   : > { %v2403_v30 = vadd.f32 %v3364_v29, %v4119_v35  ;;  %v2394_v31 = vpop.f32.mrb[105].mxu0 }
 0x3ed   : > { %v2395_v32 = vadd.f32 %v4119_v35, %v2394_v31  ;;  %v3365_v33 = vpop.f32.mrb[106].mxu0 }
 0x3ee   : > { %v2531_v34 = vmax.f32 %v2403_v30, 0.0  ;;  %v2406_v36 = vadd.f32 %v3365_v33, %v4119_v35  ;;  %v2397_v0 = vpop.f32.mrb[107].mxu0 }
 0x3ef   : > { %v2529_v37 = vmax.f32 %v2395_v32, 0.0  ;;  %v2398_v38 = vadd.f32 %v4119_v35, %v2397_v0 }
 0x3f0   : > { %2659 = vst [vmem:[%s4127_s11 + $0x150] sm:$0xff] %v2531_v34  ;;  %v2532_v39 = vmax.f32 %v2406_v36, 0.0 }
 0x3f1   : > { %2657 = vst [vmem:[%s4127_s11 + $0x140] sm:$0xff] %v2529_v37  ;;  %v2530_v40 = vmax.f32 %v2398_v38, 0.0 }
 0x3f2   : > { %2660 = vst [vmem:[%s4127_s11 + $0x158] sm:$0xff] %v2532_v39 }
 0x3f3   : > { %2658 = vst [vmem:[%s4127_s11 + $0x148] sm:$0xff] %v2530_v40  ;;  %v3368_v41 = vpop.f32.mrb[108].mxu0 }
 0x3f4   : > { %v2419_v42 = vadd.f32 %v3368_v41, %v4119_v35  ;;  %v2410_v43 = vpop.f32.mrb[109].mxu0 }
 0x3f5   : > { %v2411_v44 = vadd.f32 %v4119_v35, %v2410_v43  ;;  %v3369_v46 = vpop.f32.mrb[110].mxu0 }
 0x3f6   : > { %v2535_v47 = vmax.f32 %v2419_v42, 0.0  ;;  %v2422_v48 = vadd.f32 %v3369_v46, %v4119_v35  ;;  %v2413_v49 = vpop.f32.mrb[111].mxu0 }
 0x3f7   : > { %v2533_v50 = vmax.f32 %v2411_v44, 0.0  ;;  %v2414_v51 = vadd.f32 %v4119_v35, %v2413_v49 }
 0x3f8   : > { %2663 = vst [vmem:[%s4127_s11 + $0x170] sm:$0xff] %v2535_v47  ;;  %v2536_v52 = vmax.f32 %v2422_v48, 0.0 }
 0x3f9   : > { %2661 = vst [vmem:[%s4127_s11 + $0x160] sm:$0xff] %v2533_v50  ;;  %v2534_v53 = vmax.f32 %v2414_v51, 0.0 }
 0x3fa   : > { %2664 = vst [vmem:[%s4127_s11 + $0x178] sm:$0xff] %v2536_v52 }
 0x3fb   : > { %2662 = vst [vmem:[%s4127_s11 + $0x168] sm:$0xff] %v2534_v53  ;;  %v3372_v54 = vpop.f32.mrb[112].mxu0 }
 0x3fc   : > { %v2435_v55 = vadd.f32 %v3372_v54, %v4119_v35  ;;  %v2426_v56 = vpop.f32.mrb[113].mxu0 }
 0x3fd   : > { %v2427_v57 = vadd.f32 %v4119_v35, %v2426_v56  ;;  %v3373_v58 = vpop.f32.mrb[114].mxu0 }
 0x3fe   : > { %v2539_v59 = vmax.f32 %v2435_v55, 0.0  ;;  %v2438_v60 = vadd.f32 %v3373_v58, %v4119_v35  ;;  %v2429_v61 = vpop.f32.mrb[115].mxu0 }
 0x3ff   : > { %v2537_v62 = vmax.f32 %v2427_v57, 0.0  ;;  %v2430_v63 = vadd.f32 %v4119_v35, %v2429_v61 }
 0x400   : > { %2667 = vst [vmem:[%s4127_s11 + $0x190] sm:$0xff] %v2539_v59  ;;  %v2540_v1 = vmax.f32 %v2438_v60, 0.0 }
 0x401   : > { %2665 = vst [vmem:[%s4127_s11 + $0x180] sm:$0xff] %v2537_v62  ;;  %v2538_v2 = vmax.f32 %v2430_v63, 0.0 }
 0x402   : > { %2668 = vst [vmem:[%s4127_s11 + $0x198] sm:$0xff] %v2540_v1 }
 0x403   : > { %2666 = vst [vmem:[%s4127_s11 + $0x188] sm:$0xff] %v2538_v2  ;;  %v3376_v3 = vpop.f32.mrb[116].mxu0 }
 0x404   : > { %v2451_v45 = vadd.f32 %v3376_v3, %v4119_v35  ;;  %v2442_v4 = vpop.f32.mrb[117].mxu0 }
 0x405   : > { %v2443_v5 = vadd.f32 %v4119_v35, %v2442_v4  ;;  %v3377_v6 = vpop.f32.mrb[118].mxu0 }
 0x406   : > { %v2543_v7 = vmax.f32 %v2451_v45, 0.0  ;;  %v2454_v8 = vadd.f32 %v3377_v6, %v4119_v35  ;;  %v2445_v9 = vpop.f32.mrb[119].mxu0 }
 0x407   : > { %v2541_v10 = vmax.f32 %v2443_v5, 0.0  ;;  %v2446_v11 = vadd.f32 %v4119_v35, %v2445_v9 }
 0x408   : > { %2671 = vst [vmem:[%s4127_s11 + $0x1b0] sm:$0xff] %v2543_v7  ;;  %v2544_v12 = vmax.f32 %v2454_v8, 0.0 }
 0x409   : > { %2669 = vst [vmem:[%s4127_s11 + $0x1a0] sm:$0xff] %v2541_v10  ;;  %v2542_v13 = vmax.f32 %v2446_v11, 0.0 }
 0x40a   : > { %2672 = vst [vmem:[%s4127_s11 + $0x1b8] sm:$0xff] %v2544_v12 }
 0x40b   : > { %2670 = vst [vmem:[%s4127_s11 + $0x1a8] sm:$0xff] %v2542_v13  ;;  %v3380_v14 = vpop.f32.mrb[120].mxu0 }
 0x40c   : > { %v2467_v15 = vadd.f32 %v3380_v14, %v4119_v35  ;;  %v2458_v16 = vpop.f32.mrb[121].mxu0 }
 0x40d   : > { %v2459_v17 = vadd.f32 %v4119_v35, %v2458_v16  ;;  %v3381_v18 = vpop.f32.mrb[122].mxu0 }
 0x40e   : > { %v2547_v19 = vmax.f32 %v2467_v15, 0.0  ;;  %v2470_v20 = vadd.f32 %v3381_v18, %v4119_v35  ;;  %v2461_v21 = vpop.f32.mrb[123].mxu0 }
 0x40f   : > { %v2545_v22 = vmax.f32 %v2459_v17, 0.0  ;;  %v2462_v23 = vadd.f32 %v4119_v35, %v2461_v21 }
 0x410   : > { %2675 = vst [vmem:[%s4127_s11 + $0x1d0] sm:$0xff] %v2547_v19  ;;  %v2548_v24 = vmax.f32 %v2470_v20, 0.0 }
 0x411   : > { %2673 = vst [vmem:[%s4127_s11 + $0x1c0] sm:$0xff] %v2545_v22  ;;  %v2546_v25 = vmax.f32 %v2462_v23, 0.0 }
 0x412   : > { %2676 = vst [vmem:[%s4127_s11 + $0x1d8] sm:$0xff] %v2548_v24 }
 0x413   : > { %2674 = vst [vmem:[%s4127_s11 + $0x1c8] sm:$0xff] %v2546_v25  ;;  %v3384_v26 = vpop.f32.mrb[128].mxu1 }
 0x414   : > { %v2483_v27 = vadd.f32 %v3384_v26, %v4119_v35  ;;  %v2474_v28 = vpop.f32.mrb[129].mxu1 }
 0x415   : > { %v2475_v29 = vadd.f32 %v4119_v35, %v2474_v28  ;;  %v3385_v30 = vpop.f32.mrb[130].mxu1 }
 0x416   : > { %v2551_v31 = vmax.f32 %v2483_v27, 0.0  ;;  %v2486_v32 = vadd.f32 %v3385_v30, %v4119_v35  ;;  %v2477_v33 = vpop.f32.mrb[131].mxu1 }
 0x417   : > { %v2549_v34 = vmax.f32 %v2475_v29, 0.0  ;;  %v2478_v36 = vadd.f32 %v4119_v35, %v2477_v33 }
 0x418   : > { %2679 = vst [vmem:[%s4127_s11 + $0x1f0] sm:$0xff] %v2551_v31  ;;  %v2552_v0 = vmax.f32 %v2486_v32, 0.0 }
 0x419   : > { %2677 = vst [vmem:[%s4127_s11 + $0x1e0] sm:$0xff] %v2549_v34  ;;  %v2550_v37 = vmax.f32 %v2478_v36, 0.0 }
 0x41a   : > { %2680 = vst [vmem:[%s4127_s11 + $0x1f8] sm:$0xff] %v2552_v0 }
 0x41b   : > { %2678 = vst [vmem:[%s4127_s11 + $0x1e8] sm:$0xff] %v2550_v37 }
 0x41c   : > { %3504 = shalt.err (!%p3501_p3)
}
 0x41d   : > { %s3505_s29 = scalar_lea.hbm %s4255_s26, 8192  ;;  %s3509_s20 = scalar_lea.hbm %s4314_s9, 16384 }
 0x41e   : > { %p3506_p4 = scmp.ne.s32.totalorder %s4255_s26, %s3505_s29  ;;  %p3510_p9 = scmp.lt.u32.totalorder %s4255_s26, %s4314_s9 }
 0x41f   : > { %p3511_p10 = scmp.lt.u32.totalorder %s3509_s20, %s3505_s29  ;;  %p3513_p12 = scmp.lt.u32.totalorder %s3505_s29, %s4255_s26 }
 0x420   : > { %p3507_p7 = pnand %p3506_p4, %p3651_p5 }
 0x421   : > { %p3512_p11 = por %p3511_p10, %p3510_p9 }
 0x422   : > { %p3508_p8 = pneg %p3507_p7 }
 0x423   : > { %p3514_p13 = por %p3513_p12, %p3512_p11 }
 0x425   : > { %p3515_p0 = pnand %p3514_p13, %p3508_p8 }
 0x427   : > { %3518 = shalt.err (!%p3515_p0)
}
 0x428   : > { %s3556_s28 = smov 128   ;;  %s3557_s30 = smov 8  }
 0x429   : > { %3394 = dma.vmem_to_hbm [thread:$0]  (%p3651_p5), %s4257_s18, 8192, %s4255_s26, %s4264_s17, %s3556_s28, %s3556_s28, %s3557_s30  }
 0x42a PF: > { %p3400_p1 = scmp.ge.s32.totalorder %s3553_s16, 2  ;;  %s2719_s27 = sand.u32 1, %s3541_s13  }
 0x42b   : > { %s2720_s29 = scalar_lea.sflag [#allocation3], %s2719_s27 }
 0x42c   : > { %p3397_p2 = pnand %p3400_p1, %p3655_p6 }
 0x42e   : > { %3536 = dma.done.wait (!%p3397_p2), %s2720_s29, 8192  }
 0x42f   : > { %3538 = vsyncadd (!%p3397_p2), %s2720_s29, 4294959104  ;;  %p21_p3 = scmp.ge.s32.totalorder %s3638_s19, 4   ;;  %s4318_s13 = smov %s3545_s14 }
 0x430   : > { %s4319_s14 = smov %s3549_s15  ;;  %s4320_s15 = smov %s3649_s22 }
 0x431   : > { %s4321_s16 = smov %s3638_s19  ;;  %23 = sbr.rel (!%p21_p3) target bundleno = 3 (0x3), region = 103 }
 0x438   :  { %2733 = vsyncpa [#allocation3], 1 }
 0x439   :  { %2735 = vsyncpa [#allocation3 + $0x1], 1 }

</bundles_post_ra>
